<compile_context>
chip_gen: v7x
topology: tpu7x:2x2x1
jax: 0.10.0
libtpu: 0.0.40
codegen_flags: <defaults>
</compile_context>

<pallas_src>
import functools

import jax
import jax.numpy as jnp
from jax.experimental import pallas as pl
from jax.experimental.pallas import tpu as pltpu


# ---------------------------------------------------------------------------
# helpers
# ---------------------------------------------------------------------------

def _round_up(x, m):
    return ((x + m - 1) // m) * m


def _pad2(a, rows, cols):
    r, c = a.shape
    if r == rows and c == cols:
        return a
    return jnp.pad(a, ((0, rows - r), (0, cols - c)))


# Preferred tile sizes: lane dim a multiple of 128, sublane a multiple of 8.
# 256x256 f32/bf16 tiles (with full-K operands <= 3072) stay well under the
# 32 MiB default scoped VMEM, so the same tiling is safe on v5e/v6e/v7x while
# still amortizing per-grid-step overhead.
_TM = 256
_TN = 256


def _gelu_exact(x):
    """Exact (erf) GELU == nn.GELU(), with erf built from exp/select so it
    lowers on Mosaic without relying on an erf primitive (|err| <= 1.5e-7)."""
    ax = jnp.abs(x) * 0.7071067811865476
    t = 1.0 / (1.0 + 0.3275911 * ax)
    poly = ((((1.061405429 * t - 1.453152027) * t + 1.421413741) * t
             - 0.284496736) * t + 0.254829592) * t
    erf_abs = 1.0 - poly * jnp.exp(-ax * ax)
    erf = jnp.where(x >= 0.0, erf_abs, -erf_abs)
    return x * 0.5 * (1.0 + erf)


# ---------------------------------------------------------------------------
# Pallas kernels
# ---------------------------------------------------------------------------

def _linear_kernel(x_ref, w_ref, b_ref, o_ref, *, activation):
    y = jnp.dot(x_ref[...].astype(jnp.bfloat16), w_ref[...],
                preferred_element_type=jnp.float32)
    y = y + b_ref[...]
    if activation == "gelu":
        y = _gelu_exact(y)
    o_ref[...] = y.astype(o_ref.dtype)


def _linear_residual_kernel(x_ref, w_ref, b_ref, r_ref, o_ref):
    y = jnp.dot(x_ref[...].astype(jnp.bfloat16), w_ref[...],
                preferred_element_type=jnp.float32)
    o_ref[...] = (y + b_ref[...] + r_ref[...].astype(jnp.float32)).astype(o_ref.dtype)


def _ln_linear_kernel(x_ref, g_ref, beta_ref, w_ref, b_ref, o_ref, *, eps, activation):
    x = x_ref[...].astype(jnp.float32)                  # (tm, K) full-K row block
    mean = jnp.mean(x, axis=-1, keepdims=True)
    xc = x - mean
    var = jnp.mean(xc * xc, axis=-1, keepdims=True)     # biased variance (PyTorch LN)
    h = xc * jax.lax.rsqrt(var + eps) * g_ref[...] + beta_ref[...]
    y = jnp.dot(h.astype(jnp.bfloat16), w_ref[...],
                preferred_element_type=jnp.float32)
    y = y + b_ref[...]
    if activation == "gelu":
        y = _gelu_exact(y)
    o_ref[...] = y.astype(o_ref.dtype)


def pallas_linear(x, w, b, *, activation=None, residual=None, ln=None, eps=1e-6):
    """y = (LN(x) if ln else x) @ w + b [+ GELU] [+ residual].

    x:(M,K) f32, w:(K,N) (bf16 on the MXU), b:(N,), residual:(M,N), ln=(gamma,beta).
    Tiled over (M, N) with lane-dense padded tiles; K stays whole per block.
    """
    M, K = x.shape
    N = w.shape[1]

    tm = min(_TM, _round_up(M, 8))
    m_pad = _round_up(M, tm)
    tn = min(_TN, _round_up(N, 128))
    n_pad = _round_up(N, tn)

    xp = _pad2(x, m_pad, K)
    wp = _pad2(w.astype(jnp.bfloat16), K, n_pad)
    bp = _pad2(b.reshape(1, N).astype(jnp.float32), 1, n_pad)

    x_spec = pl.BlockSpec((tm, K), lambda i, j: (i, 0))
    w_spec = pl.BlockSpec((K, tn), lambda i, j: (0, j))
    b_spec = pl.BlockSpec((1, tn), lambda i, j: (0, j))
    o_spec = pl.BlockSpec((tm, tn), lambda i, j: (i, j))

    if ln is not None:
        gamma, beta = ln
        kernel = functools.partial(_ln_linear_kernel, eps=eps, activation=activation)
        in_specs = [x_spec,
                    pl.BlockSpec((1, K), lambda i, j: (0, 0)),
                    pl.BlockSpec((1, K), lambda i, j: (0, 0)),
                    w_spec, b_spec]
        args = (xp, gamma.reshape(1, K).astype(jnp.float32),
                beta.reshape(1, K).astype(jnp.float32), wp, bp)
    elif residual is not None:
        kernel = _linear_residual_kernel
        in_specs = [x_spec, w_spec, b_spec, o_spec]
        args = (xp, wp, bp, _pad2(residual, m_pad, n_pad))
    else:
        kernel = functools.partial(_linear_kernel, activation=activation)
        in_specs = [x_spec, w_spec, b_spec]
        args = (xp, wp, bp)

    flops = 2 * m_pad * K * n_pad
    bytes_accessed = xp.size * 4 + wp.size * 2 + m_pad * n_pad * 4
    transcendentals = m_pad * n_pad if activation == "gelu" else 0

    out = pl.pallas_call(
        kernel,
        out_shape=jax.ShapeDtypeStruct((m_pad, n_pad), jnp.float32),
        grid=(m_pad // tm, n_pad // tn),
        in_specs=in_specs,
        out_specs=o_spec,
        compiler_params=pltpu.CompilerParams(
            dimension_semantics=("parallel", "parallel")),
        cost_estimate=pl.CostEstimate(flops=flops,
                                      transcendentals=transcendentals,
                                      bytes_accessed=bytes_accessed),
    )(*args)
    return out[:M, :N]


def _attention_kernel(qkv_ref, o_ref, *, num_heads, head_dim, scale):
    E = num_heads * head_dim
    qkv = qkv_ref[0]                                    # (N, 3E) f32, PyTorch layout
    outs = []
    for h in range(num_heads):                          # static unroll over heads
        lo = h * head_dim
        q = (qkv[:, lo:lo + head_dim] * scale).astype(jnp.bfloat16)
        k = qkv[:, E + lo:E + lo + head_dim].astype(jnp.bfloat16)
        v = qkv[:, 2 * E + lo:2 * E + lo + head_dim].astype(jnp.bfloat16)
        # q @ k^T without an explicit transpose (contract head_dim axes directly)
        s = jax.lax.dot_general(q, k, (((1,), (1,)), ((), ())),
                                preferred_element_type=jnp.float32)
        s = s - jnp.max(s, axis=-1, keepdims=True)      # stable softmax
        p = jnp.exp(s)
        l = jnp.sum(p, axis=-1, keepdims=True)
        o = jnp.dot(p.astype(jnp.bfloat16), v, preferred_element_type=jnp.float32)
        outs.append(o * pl.reciprocal(l, approx=True))  # normalize (N,D), not (N,N)
    # single lane-dense (N, E) store
    o_ref[0] = jnp.concatenate(outs, axis=-1).astype(o_ref.dtype)


def pallas_attention(qkv, *, num_heads, scale):
    """Multi-head softmax(q k^T * scale) v.  qkv:(B, N, 3E) with the PyTorch
    [3, num_heads, head_dim] column layout; returns (B, N, E)."""
    B, N, threeE = qkv.shape
    E = threeE // 3
    head_dim = E // num_heads
    kernel = functools.partial(_attention_kernel, num_heads=num_heads,
                               head_dim=head_dim, scale=scale)
    return pl.pallas_call(
        kernel,
        out_shape=jax.ShapeDtypeStruct((B, N, E), jnp.float32),
        grid=(B,),
        in_specs=[pl.BlockSpec((1, N, threeE), lambda b: (b, 0, 0))],
        out_specs=pl.BlockSpec((1, N, E), lambda b: (b, 0, 0)),
        compiler_params=pltpu.CompilerParams(dimension_semantics=("parallel",)),
    )(qkv)


# ---------------------------------------------------------------------------
# Parameter init (deterministic, synthetic).  Matmul weights stored bf16
# (MXU-native, halves weight HBM traffic); biases / LN / embeddings f32.
# Static config (patch_size, num_heads) is intentionally NOT stored here.
# ---------------------------------------------------------------------------

def _trunc_normal(key, shape, std=0.02, dtype=jnp.float32):
    return (std * jax.random.truncated_normal(key, -2.0, 2.0, shape,
                                              jnp.float32)).astype(dtype)


def init_params(key, *, img_size, patch_size, in_chans, embed_dim, depth,
                num_heads, mlp_ratio, num_classes):
    del num_heads  # static config, kept out of the traced pytree
    num_patches = (img_size // patch_size) ** 2
    hidden = int(embed_dim * mlp_ratio)
    keys = iter(jax.random.split(key, 8 + depth * 6))
    wdt = jnp.bfloat16

    params = {
        # Conv2d(in_chans, embed_dim, k=P, s=P) flattened to a matmul weight
        "w_patch": _trunc_normal(next(keys),
                                 (in_chans * patch_size * patch_size, embed_dim),
                                 dtype=wdt),
        "b_patch": jnp.zeros((embed_dim,), jnp.float32),
        "cls_token": _trunc_normal(next(keys), (1, 1, embed_dim)),
        "pos_embed": _trunc_normal(next(keys), (1, num_patches + 1, embed_dim)),
        "ln_g": jnp.ones((embed_dim,), jnp.float32),
        "ln_b": jnp.zeros((embed_dim,), jnp.float32),
        "w_head": _trunc_normal(next(keys), (embed_dim, num_classes), dtype=wdt),
        "b_head": jnp.zeros((num_classes,), jnp.float32),
        "blocks": [],
    }
    for _ in range(depth):
        blk = {
            "ln1_g": jnp.ones((embed_dim,), jnp.float32),
            "ln1_b": jnp.zeros((embed_dim,), jnp.float32),
            "w_qkv": _trunc_normal(next(keys), (embed_dim, 3 * embed_dim), dtype=wdt),
            "b_qkv": jnp.zeros((3 * embed_dim,), jnp.float32),   # qkv_bias=True
            "w_proj": _trunc_normal(next(keys), (embed_dim, embed_dim), dtype=wdt),
            "b_proj": jnp.zeros((embed_dim,), jnp.float32),
            "ln2_g": jnp.ones((embed_dim,), jnp.float32),
            "ln2_b": jnp.zeros((embed_dim,), jnp.float32),
            "w_fc1": _trunc_normal(next(keys), (embed_dim, hidden), dtype=wdt),
            "b_fc1": jnp.zeros((hidden,), jnp.float32),
            "w_fc2": _trunc_normal(next(keys), (hidden, embed_dim), dtype=wdt),
            "b_fc2": jnp.zeros((embed_dim,), jnp.float32),
        }
        params["blocks"].append(blk)
    return params


# ---------------------------------------------------------------------------
# Forward pass
# ---------------------------------------------------------------------------

def vit_forward(params, x_nchw, *, patch_size, num_heads, eps=1e-6):
    # TODO(synk): file-dumping hooks (hook_actin/hook_linear/hook_normin writing
    #             ./export/*.txt) are side effects with no kernel equivalent and
    #             are omitted; QAct/QLinear quantizers, QIntSoftmax log-int path
    #             and dropouts are identity in the quant=False / p=0 float path.
    B, C, H, W = x_nchw.shape
    P = patch_size
    E = params["w_patch"].shape[1]
    head_dim = E // num_heads
    scale = head_dim ** (-0.5)

    # --- patch embed (Conv2d k=P s=P == matmul over flattened patches) ---
    nph, npw = H // P, W // P
    patches = x_nchw.reshape(B, C, nph, P, npw, P)
    patches = patches.transpose(0, 2, 4, 1, 3, 5).reshape(B * nph * npw, C * P * P)
    x = pallas_linear(patches, params["w_patch"], params["b_patch"])
    x = x.reshape(B, nph * npw, E)

    # --- cls token + pos embed ---
    cls = jnp.broadcast_to(params["cls_token"].astype(jnp.float32), (B, 1, E))
    x = jnp.concatenate([cls, x], axis=1) + params["pos_embed"]
    N = x.shape[1]
    x = x.reshape(B * N, E)

    # --- transformer blocks ---
    for blk in params["blocks"]:
        # attention branch: LN1 fused into qkv matmul, residual fused into proj
        qkv = pallas_linear(x, blk["w_qkv"], blk["b_qkv"],
                            ln=(blk["ln1_g"], blk["ln1_b"]), eps=eps)
        attn = pallas_attention(qkv.reshape(B, N, 3 * E),
                                num_heads=num_heads, scale=scale)
        x = pallas_linear(attn.reshape(B * N, E), blk["w_proj"], blk["b_proj"],
                          residual=x)

        # mlp branch: LN2 fused into fc1+GELU, residual fused into fc2
        h = pallas_linear(x, blk["w_fc1"], blk["b_fc1"], activation="gelu",
                          ln=(blk["ln2_g"], blk["ln2_b"]), eps=eps)
        x = pallas_linear(h, blk["w_fc2"], blk["b_fc2"], residual=x)

    # --- final norm, cls-token readout, head ---
    # LayerNorm is per-token, so norm(x)[:, 0] == norm(x[:, 0]); fuse it into head.
    cls_tok = x.reshape(B, N, E)[:, 0]
    logits = pallas_linear(cls_tok, params["w_head"], params["b_head"],
                           ln=(params["ln_g"], params["ln_b"]), eps=eps)
    return logits


# ---------------------------------------------------------------------------
if __name__ == "__main__":
    # Small config consistent with VisionTransformer(__init__) semantics.
    IMG, PATCH, IN_CH = 16, 4, 3
    EMBED, DEPTH, HEADS, MLP_RATIO, NUM_CLASSES = 32, 2, 4, 4.0, 10
    BATCH = 2

    key = jax.random.PRNGKey(0)
    kp, kx = jax.random.split(key)
    params = init_params(kp, img_size=IMG, patch_size=PATCH, in_chans=IN_CH,
                         embed_dim=EMBED, depth=DEPTH, num_heads=HEADS,
                         mlp_ratio=MLP_RATIO, num_classes=NUM_CLASSES)
    x = jax.random.normal(kx, (BATCH, IN_CH, IMG, IMG), jnp.float32)  # NCHW

    fwd = jax.jit(functools.partial(vit_forward, patch_size=PATCH,
                                    num_heads=HEADS, eps=1e-6))
    logits = jax.block_until_ready(fwd(params, x))
    assert logits.shape == (BATCH, NUM_CLASSES)
    assert jnp.all(jnp.isfinite(logits))
    print("KERNEL_OK")
</pallas_src>

<mosaic_0001>
module attributes {stable_mosaic.version = 11 : i64} {
  func.func @_attention_kernel(%arg0: i32, %arg1: memref<1x17x96xf32, #tpu.memory_space<vmem>>, %arg2: memref<1x17x32xf32, #tpu.memory_space<vmem>>) attributes {dimension_semantics = [#tpu.dimension_semantics<parallel>], iteration_bounds = array<i64: 2>, scalar_prefetch = 0 : i64, scratch_operands = 0 : i64, tpu.core_type = #tpu.core_type<tc>, window_params = [{transform_indices = @transform_0, window_bounds = array<i64: 1, 17, 96>}, {transform_indices = @transform_1, window_bounds = array<i64: 1, 17, 32>}]} {
    %c0 = arith.constant 0 : index
    %c0_0 = arith.constant 0 : index
    %c0_1 = arith.constant 0 : index
    %0 = vector.load %arg1[%c0, %c0_0, %c0_1] : memref<1x17x96xf32, #tpu.memory_space<vmem>>, vector<1x17x96xf32>
    %1 = vector.shape_cast %0 : vector<1x17x96xf32> to vector<17x96xf32>
    %2 = vector.extract_strided_slice %1 {offsets = [0, 0], sizes = [17, 8], strides = [1, 1]} : vector<17x96xf32> to vector<17x8xf32>
    %cst = arith.constant 0.353553385 : f32
    %3 = vector.broadcast %cst : f32 to vector<17x8xf32>
    %4 = arith.mulf %2, %3 : vector<17x8xf32>
    %5 = arith.truncf %4 : vector<17x8xf32> to vector<17x8xbf16>
    %6 = vector.extract_strided_slice %1 {offsets = [0, 32], sizes = [17, 8], strides = [1, 1]} : vector<17x96xf32> to vector<17x8xf32>
    %7 = arith.truncf %6 : vector<17x8xf32> to vector<17x8xbf16>
    %8 = vector.extract_strided_slice %1 {offsets = [0, 64], sizes = [17, 8], strides = [1, 1]} : vector<17x96xf32> to vector<17x8xf32>
    %9 = arith.truncf %8 : vector<17x8xf32> to vector<17x8xbf16>
    %cst_2 = arith.constant dense<0.000000e+00> : vector<17x17xf32>
    %10 = tpu.matmul %5, %7, %cst_2 {dimension_numbers = #tpu.dot_dimension_numbers<[1], [1], [0], [0], [0, 0, 1, 0], [], []>} : vector<17x8xbf16>, vector<17x8xbf16>, vector<17x17xf32> -> vector<17x17xf32>
    %cst_3 = arith.constant dense<0xFF800000> : vector<17xf32>
    %11 = vector.multi_reduction <maximumf>, %10, %cst_3 [1] : vector<17x17xf32> to vector<17xf32>
    %12 = vector.shape_cast %11 : vector<17xf32> to vector<17x1xf32>
    %13 = vector.broadcast %12 : vector<17x1xf32> to vector<17x17xf32>
    %14 = arith.subf %10, %13 : vector<17x17xf32>
    %15 = math.exp %14 : vector<17x17xf32>
    %cst_4 = arith.constant dense<0.000000e+00> : vector<17xf32>
    %16 = vector.multi_reduction <add>, %15, %cst_4 [1] : vector<17x17xf32> to vector<17xf32>
    %17 = vector.shape_cast %16 : vector<17xf32> to vector<17x1xf32>
    %18 = arith.truncf %15 : vector<17x17xf32> to vector<17x17xbf16>
    %cst_5 = arith.constant dense<0.000000e+00> : vector<17x8xf32>
    %19 = tpu.matmul %18, %9, %cst_5 {dimension_numbers = #tpu.dot_dimension_numbers<[1], [0], [0], [1], [0, 0, 1, 1], [], []>} : vector<17x17xbf16>, vector<17x8xbf16>, vector<17x8xf32> -> vector<17x8xf32>
    %20 = tpu.reciprocal %17 {approx = true} : vector<17x1xf32> -> vector<17x1xf32>
    %21 = vector.broadcast %20 : vector<17x1xf32> to vector<17x8xf32>
    %22 = arith.mulf %19, %21 : vector<17x8xf32>
    %23 = vector.extract_strided_slice %1 {offsets = [0, 8], sizes = [17, 8], strides = [1, 1]} : vector<17x96xf32> to vector<17x8xf32>
    %cst_6 = arith.constant 0.353553385 : f32
    %24 = vector.broadcast %cst_6 : f32 to vector<17x8xf32>
    %25 = arith.mulf %23, %24 : vector<17x8xf32>
    %26 = arith.truncf %25 : vector<17x8xf32> to vector<17x8xbf16>
    %27 = vector.extract_strided_slice %1 {offsets = [0, 40], sizes = [17, 8], strides = [1, 1]} : vector<17x96xf32> to vector<17x8xf32>
    %28 = arith.truncf %27 : vector<17x8xf32> to vector<17x8xbf16>
    %29 = vector.extract_strided_slice %1 {offsets = [0, 72], sizes = [17, 8], strides = [1, 1]} : vector<17x96xf32> to vector<17x8xf32>
    %30 = arith.truncf %29 : vector<17x8xf32> to vector<17x8xbf16>
    %cst_7 = arith.constant dense<0.000000e+00> : vector<17x17xf32>
    %31 = tpu.matmul %26, %28, %cst_7 {dimension_numbers = #tpu.dot_dimension_numbers<[1], [1], [0], [0], [0, 0, 1, 0], [], []>} : vector<17x8xbf16>, vector<17x8xbf16>, vector<17x17xf32> -> vector<17x17xf32>
    %cst_8 = arith.constant dense<0xFF800000> : vector<17xf32>
    %32 = vector.multi_reduction <maximumf>, %31, %cst_8 [1] : vector<17x17xf32> to vector<17xf32>
    %33 = vector.shape_cast %32 : vector<17xf32> to vector<17x1xf32>
    %34 = vector.broadcast %33 : vector<17x1xf32> to vector<17x17xf32>
    %35 = arith.subf %31, %34 : vector<17x17xf32>
    %36 = math.exp %35 : vector<17x17xf32>
    %cst_9 = arith.constant dense<0.000000e+00> : vector<17xf32>
    %37 = vector.multi_reduction <add>, %36, %cst_9 [1] : vector<17x17xf32> to vector<17xf32>
    %38 = vector.shape_cast %37 : vector<17xf32> to vector<17x1xf32>
    %39 = arith.truncf %36 : vector<17x17xf32> to vector<17x17xbf16>
    %cst_10 = arith.constant dense<0.000000e+00> : vector<17x8xf32>
    %40 = tpu.matmul %39, %30, %cst_10 {dimension_numbers = #tpu.dot_dimension_numbers<[1], [0], [0], [1], [0, 0, 1, 1], [], []>} : vector<17x17xbf16>, vector<17x8xbf16>, vector<17x8xf32> -> vector<17x8xf32>
    %41 = tpu.reciprocal %38 {approx = true} : vector<17x1xf32> -> vector<17x1xf32>
    %42 = vector.broadcast %41 : vector<17x1xf32> to vector<17x8xf32>
    %43 = arith.mulf %40, %42 : vector<17x8xf32>
    %44 = vector.extract_strided_slice %1 {offsets = [0, 16], sizes = [17, 8], strides = [1, 1]} : vector<17x96xf32> to vector<17x8xf32>
    %cst_11 = arith.constant 0.353553385 : f32
    %45 = vector.broadcast %cst_11 : f32 to vector<17x8xf32>
    %46 = arith.mulf %44, %45 : vector<17x8xf32>
    %47 = arith.truncf %46 : vector<17x8xf32> to vector<17x8xbf16>
    %48 = vector.extract_strided_slice %1 {offsets = [0, 48], sizes = [17, 8], strides = [1, 1]} : vector<17x96xf32> to vector<17x8xf32>
    %49 = arith.truncf %48 : vector<17x8xf32> to vector<17x8xbf16>
    %50 = vector.extract_strided_slice %1 {offsets = [0, 80], sizes = [17, 8], strides = [1, 1]} : vector<17x96xf32> to vector<17x8xf32>
    %51 = arith.truncf %50 : vector<17x8xf32> to vector<17x8xbf16>
    %cst_12 = arith.constant dense<0.000000e+00> : vector<17x17xf32>
    %52 = tpu.matmul %47, %49, %cst_12 {dimension_numbers = #tpu.dot_dimension_numbers<[1], [1], [0], [0], [0, 0, 1, 0], [], []>} : vector<17x8xbf16>, vector<17x8xbf16>, vector<17x17xf32> -> vector<17x17xf32>
    %cst_13 = arith.constant dense<0xFF800000> : vector<17xf32>
    %53 = vector.multi_reduction <maximumf>, %52, %cst_13 [1] : vector<17x17xf32> to vector<17xf32>
    %54 = vector.shape_cast %53 : vector<17xf32> to vector<17x1xf32>
    %55 = vector.broadcast %54 : vector<17x1xf32> to vector<17x17xf32>
    %56 = arith.subf %52, %55 : vector<17x17xf32>
    %57 = math.exp %56 : vector<17x17xf32>
    %cst_14 = arith.constant dense<0.000000e+00> : vector<17xf32>
    %58 = vector.multi_reduction <add>, %57, %cst_14 [1] : vector<17x17xf32> to vector<17xf32>
    %59 = vector.shape_cast %58 : vector<17xf32> to vector<17x1xf32>
    %60 = arith.truncf %57 : vector<17x17xf32> to vector<17x17xbf16>
    %cst_15 = arith.constant dense<0.000000e+00> : vector<17x8xf32>
    %61 = tpu.matmul %60, %51, %cst_15 {dimension_numbers = #tpu.dot_dimension_numbers<[1], [0], [0], [1], [0, 0, 1, 1], [], []>} : vector<17x17xbf16>, vector<17x8xbf16>, vector<17x8xf32> -> vector<17x8xf32>
    %62 = tpu.reciprocal %59 {approx = true} : vector<17x1xf32> -> vector<17x1xf32>
    %63 = vector.broadcast %62 : vector<17x1xf32> to vector<17x8xf32>
    %64 = arith.mulf %61, %63 : vector<17x8xf32>
    %65 = vector.extract_strided_slice %1 {offsets = [0, 24], sizes = [17, 8], strides = [1, 1]} : vector<17x96xf32> to vector<17x8xf32>
    %cst_16 = arith.constant 0.353553385 : f32
    %66 = vector.broadcast %cst_16 : f32 to vector<17x8xf32>
    %67 = arith.mulf %65, %66 : vector<17x8xf32>
    %68 = arith.truncf %67 : vector<17x8xf32> to vector<17x8xbf16>
    %69 = vector.extract_strided_slice %1 {offsets = [0, 56], sizes = [17, 8], strides = [1, 1]} : vector<17x96xf32> to vector<17x8xf32>
    %70 = arith.truncf %69 : vector<17x8xf32> to vector<17x8xbf16>
    %71 = vector.extract_strided_slice %1 {offsets = [0, 88], sizes = [17, 8], strides = [1, 1]} : vector<17x96xf32> to vector<17x8xf32>
    %72 = arith.truncf %71 : vector<17x8xf32> to vector<17x8xbf16>
    %cst_17 = arith.constant dense<0.000000e+00> : vector<17x17xf32>
    %73 = tpu.matmul %68, %70, %cst_17 {dimension_numbers = #tpu.dot_dimension_numbers<[1], [1], [0], [0], [0, 0, 1, 0], [], []>} : vector<17x8xbf16>, vector<17x8xbf16>, vector<17x17xf32> -> vector<17x17xf32>
    %cst_18 = arith.constant dense<0xFF800000> : vector<17xf32>
    %74 = vector.multi_reduction <maximumf>, %73, %cst_18 [1] : vector<17x17xf32> to vector<17xf32>
    %75 = vector.shape_cast %74 : vector<17xf32> to vector<17x1xf32>
    %76 = vector.broadcast %75 : vector<17x1xf32> to vector<17x17xf32>
    %77 = arith.subf %73, %76 : vector<17x17xf32>
    %78 = math.exp %77 : vector<17x17xf32>
    %cst_19 = arith.constant dense<0.000000e+00> : vector<17xf32>
    %79 = vector.multi_reduction <add>, %78, %cst_19 [1] : vector<17x17xf32> to vector<17xf32>
    %80 = vector.shape_cast %79 : vector<17xf32> to vector<17x1xf32>
    %81 = arith.truncf %78 : vector<17x17xf32> to vector<17x17xbf16>
    %cst_20 = arith.constant dense<0.000000e+00> : vector<17x8xf32>
    %82 = tpu.matmul %81, %72, %cst_20 {dimension_numbers = #tpu.dot_dimension_numbers<[1], [0], [0], [1], [0, 0, 1, 1], [], []>} : vector<17x17xbf16>, vector<17x8xbf16>, vector<17x8xf32> -> vector<17x8xf32>
    %83 = tpu.reciprocal %80 {approx = true} : vector<17x1xf32> -> vector<17x1xf32>
    %84 = vector.broadcast %83 : vector<17x1xf32> to vector<17x8xf32>
    %85 = arith.mulf %82, %84 : vector<17x8xf32>
    %86 = tpu.concatenate %22, %43, %64, %85 in 1 : vector<17x8xf32>, vector<17x8xf32>, vector<17x8xf32>, vector<17x8xf32> -> vector<17x32xf32>
    %c0_21 = arith.constant 0 : index
    %c0_22 = arith.constant 0 : index
    %c0_23 = arith.constant 0 : index
    %87 = vector.load %arg2[%c0_21, %c0_22, %c0_23] : memref<1x17x32xf32, #tpu.memory_space<vmem>>, vector<1x17x32xf32>
    %88 = vector.shape_cast %87 : vector<1x17x32xf32> to vector<17x32xf32>
    %89 = vector.shape_cast %86 : vector<17x32xf32> to vector<1x17x32xf32>
    tpu.vector_store %arg2[%c0_21, %c0_22, %c0_23], %89 {strides = array<i32>} : memref<1x17x32xf32, #tpu.memory_space<vmem>>, vector<1x17x32xf32>,
    return
  }
  func.func @transform_0(%arg0: i32) -> (i32, i32, i32) {
    %c0_i32 = arith.constant 0 : i32
    %c0_i32_0 = arith.constant 0 : i32
    %c0_i32_1 = arith.constant 0 : i32
    return %arg0, %c0_i32, %c0_i32_0 : i32, i32, i32
  }
  func.func @transform_1(%arg0: i32) -> (i32, i32, i32) {
    %c0_i32 = arith.constant 0 : i32
    %c0_i32_0 = arith.constant 0 : i32
    %c0_i32_1 = arith.constant 0 : i32
    return %arg0, %c0_i32, %c0_i32_0 : i32, i32, i32
  }
}

module attributes {stable_mosaic.version = 11 : i64} {
  func.func @_linear_kernel(%arg0: i32, %arg1: i32, %arg2: memref<32x48xf32, #tpu.memory_space<vmem>>, %arg3: memref<48x128xbf16, #tpu.memory_space<vmem>>, %arg4: memref<1x128xf32, #tpu.memory_space<vmem>>, %arg5: memref<32x128xf32, #tpu.memory_space<vmem>>) attributes {dimension_semantics = [#tpu.dimension_semantics<parallel>, #tpu.dimension_semantics<parallel>], iteration_bounds = array<i64: 1, 1>, scalar_prefetch = 0 : i64, scratch_operands = 0 : i64, tpu.core_type = #tpu.core_type<tc>, window_params = [{transform_indices = @transform_0, window_bounds = array<i64: 32, 48>}, {transform_indices = @transform_1, window_bounds = array<i64: 48, 128>}, {transform_indices = @transform_2, window_bounds = array<i64: 1, 128>}, {transform_indices = @transform_3, window_bounds = array<i64: 32, 128>}]} {
    %c0 = arith.constant 0 : index
    %c0_0 = arith.constant 0 : index
    %0 = vector.load %arg2[%c0, %c0_0] : memref<32x48xf32, #tpu.memory_space<vmem>>, vector<32x48xf32>
    %1 = arith.truncf %0 : vector<32x48xf32> to vector<32x48xbf16>
    %c0_1 = arith.constant 0 : index
    %c0_2 = arith.constant 0 : index
    %2 = vector.load %arg3[%c0_1, %c0_2] : memref<48x128xbf16, #tpu.memory_space<vmem>>, vector<48x128xbf16>
    %cst = arith.constant dense<0.000000e+00> : vector<32x128xf32>
    %3 = tpu.matmul %1, %2, %cst {dimension_numbers = #tpu.dot_dimension_numbers<[1], [0], [0], [1], [0, 0, 1, 1], [], []>} : vector<32x48xbf16>, vector<48x128xbf16>, vector<32x128xf32> -> vector<32x128xf32>
    %c0_3 = arith.constant 0 : index
    %c0_4 = arith.constant 0 : index
    %4 = vector.load %arg4[%c0_3, %c0_4] : memref<1x128xf32, #tpu.memory_space<vmem>>, vector<1x128xf32>
    %5 = vector.broadcast %4 : vector<1x128xf32> to vector<32x128xf32>
    %6 = arith.addf %3, %5 : vector<32x128xf32>
    %c0_5 = arith.constant 0 : index
    %c0_6 = arith.constant 0 : index
    %7 = vector.load %arg5[%c0_5, %c0_6] : memref<32x128xf32, #tpu.memory_space<vmem>>, vector<32x128xf32>
    tpu.vector_store %arg5[%c0_5, %c0_6], %6 {strides = array<i32>} : memref<32x128xf32, #tpu.memory_space<vmem>>, vector<32x128xf32>,
    return
  }
  func.func @transform_0(%arg0: i32, %arg1: i32) -> (i32, i32) {
    %c0_i32 = arith.constant 0 : i32
    %c0_i32_0 = arith.constant 0 : i32
    return %arg0, %c0_i32 : i32, i32
  }
  func.func @transform_1(%arg0: i32, %arg1: i32) -> (i32, i32) {
    %c0_i32 = arith.constant 0 : i32
    %c0_i32_0 = arith.constant 0 : i32
    return %c0_i32, %arg1 : i32, i32
  }
  func.func @transform_2(%arg0: i32, %arg1: i32) -> (i32, i32) {
    %c0_i32 = arith.constant 0 : i32
    %c0_i32_0 = arith.constant 0 : i32
    return %c0_i32, %arg1 : i32, i32
  }
  func.func @transform_3(%arg0: i32, %arg1: i32) -> (i32, i32) {
    %c0_i32 = arith.constant 0 : i32
    return %arg0, %arg1 : i32, i32
  }
}

module attributes {stable_mosaic.version = 11 : i64} {
  func.func @_ln_linear_kernel(%arg0: i32, %arg1: i32, %arg2: memref<40x32xf32, #tpu.memory_space<vmem>>, %arg3: memref<1x32xf32, #tpu.memory_space<vmem>>, %arg4: memref<1x32xf32, #tpu.memory_space<vmem>>, %arg5: memref<32x128xbf16, #tpu.memory_space<vmem>>, %arg6: memref<1x128xf32, #tpu.memory_space<vmem>>, %arg7: memref<40x128xf32, #tpu.memory_space<vmem>>) attributes {dimension_semantics = [#tpu.dimension_semantics<parallel>, #tpu.dimension_semantics<parallel>], iteration_bounds = array<i64: 1, 1>, scalar_prefetch = 0 : i64, scratch_operands = 0 : i64, tpu.core_type = #tpu.core_type<tc>, window_params = [{transform_indices = @transform_0, window_bounds = array<i64: 40, 32>}, {pipeline_mode = #tpu.pipeline_mode<synchronous>, transform_indices = @transform_1, window_bounds = array<i64: 1, 32>}, {pipeline_mode = #tpu.pipeline_mode<synchronous>, transform_indices = @transform_2, window_bounds = array<i64: 1, 32>}, {transform_indices = @transform_3, window_bounds = array<i64: 32, 128>}, {transform_indices = @transform_4, window_bounds = array<i64: 1, 128>}, {transform_indices = @transform_5, window_bounds = array<i64: 40, 128>}]} {
    %c0 = arith.constant 0 : index
    %c0_0 = arith.constant 0 : index
    %0 = vector.load %arg2[%c0, %c0_0] : memref<40x32xf32, #tpu.memory_space<vmem>>, vector<40x32xf32>
    %cst = arith.constant dense<0.000000e+00> : vector<40xf32>
    %1 = vector.multi_reduction <add>, %0, %cst [1] : vector<40x32xf32> to vector<40xf32>
    %2 = vector.shape_cast %1 : vector<40xf32> to vector<40x1xf32>
    %cst_1 = arith.constant 3.200000e+01 : f32
    %3 = vector.broadcast %cst_1 : f32 to vector<40x1xf32>
    %4 = arith.divf %2, %3 : vector<40x1xf32>
    %5 = vector.broadcast %4 : vector<40x1xf32> to vector<40x32xf32>
    %6 = arith.subf %0, %5 : vector<40x32xf32>
    %7 = arith.mulf %6, %6 : vector<40x32xf32>
    %cst_2 = arith.constant dense<0.000000e+00> : vector<40xf32>
    %8 = vector.multi_reduction <add>, %7, %cst_2 [1] : vector<40x32xf32> to vector<40xf32>
    %9 = vector.shape_cast %8 : vector<40xf32> to vector<40x1xf32>
    %cst_3 = arith.constant 3.200000e+01 : f32
    %10 = vector.broadcast %cst_3 : f32 to vector<40x1xf32>
    %11 = arith.divf %9, %10 : vector<40x1xf32>
    %cst_4 = arith.constant 9.99999997E-7 : f32
    %12 = vector.broadcast %cst_4 : f32 to vector<40x1xf32>
    %13 = arith.addf %11, %12 : vector<40x1xf32>
    %14 = math.rsqrt %13 : vector<40x1xf32>
    %15 = vector.broadcast %14 : vector<40x1xf32> to vector<40x32xf32>
    %16 = arith.mulf %6, %15 : vector<40x32xf32>
    %c0_5 = arith.constant 0 : index
    %c0_6 = arith.constant 0 : index
    %17 = vector.load %arg3[%c0_5, %c0_6] : memref<1x32xf32, #tpu.memory_space<vmem>>, vector<1x32xf32>
    %18 = vector.broadcast %17 : vector<1x32xf32> to vector<40x32xf32>
    %19 = arith.mulf %16, %18 : vector<40x32xf32>
    %c0_7 = arith.constant 0 : index
    %c0_8 = arith.constant 0 : index
    %20 = vector.load %arg4[%c0_7, %c0_8] : memref<1x32xf32, #tpu.memory_space<vmem>>, vector<1x32xf32>
    %21 = vector.broadcast %20 : vector<1x32xf32> to vector<40x32xf32>
    %22 = arith.addf %19, %21 : vector<40x32xf32>
    %23 = arith.truncf %22 : vector<40x32xf32> to vector<40x32xbf16>
    %c0_9 = arith.constant 0 : index
    %c0_10 = arith.constant 0 : index
    %24 = vector.load %arg5[%c0_9, %c0_10] : memref<32x128xbf16, #tpu.memory_space<vmem>>, vector<32x128xbf16>
    %cst_11 = arith.constant dense<0.000000e+00> : vector<40x128xf32>
    %25 = tpu.matmul %23, %24, %cst_11 {dimension_numbers = #tpu.dot_dimension_numbers<[1], [0], [0], [1], [0, 0, 1, 1], [], []>} : vector<40x32xbf16>, vector<32x128xbf16>, vector<40x128xf32> -> vector<40x128xf32>
    %c0_12 = arith.constant 0 : index
    %c0_13 = arith.constant 0 : index
    %26 = vector.load %arg6[%c0_12, %c0_13] : memref<1x128xf32, #tpu.memory_space<vmem>>, vector<1x128xf32>
    %27 = vector.broadcast %26 : vector<1x128xf32> to vector<40x128xf32>
    %28 = arith.addf %25, %27 : vector<40x128xf32>
    %c0_14 = arith.constant 0 : index
    %c0_15 = arith.constant 0 : index
    %29 = vector.load %arg7[%c0_14, %c0_15] : memref<40x128xf32, #tpu.memory_space<vmem>>, vector<40x128xf32>
    tpu.vector_store %arg7[%c0_14, %c0_15], %28 {strides = array<i32>} : memref<40x128xf32, #tpu.memory_space<vmem>>, vector<40x128xf32>,
    return
  }
  func.func @transform_0(%arg0: i32, %arg1: i32) -> (i32, i32) {
    %c0_i32 = arith.constant 0 : i32
    %c0_i32_0 = arith.constant 0 : i32
    return %arg0, %c0_i32 : i32, i32
  }
  func.func @transform_1(%arg0: i32, %arg1: i32) -> (i32, i32) {
    %c0_i32 = arith.constant 0 : i32
    %c0_i32_0 = arith.constant 0 : i32
    %c0_i32_1 = arith.constant 0 : i32
    return %c0_i32, %c0_i32_0 : i32, i32
  }
  func.func @transform_2(%arg0: i32, %arg1: i32) -> (i32, i32) {
    %c0_i32 = arith.constant 0 : i32
    %c0_i32_0 = arith.constant 0 : i32
    %c0_i32_1 = arith.constant 0 : i32
    return %c0_i32, %c0_i32_0 : i32, i32
  }
  func.func @transform_3(%arg0: i32, %arg1: i32) -> (i32, i32) {
    %c0_i32 = arith.constant 0 : i32
    %c0_i32_0 = arith.constant 0 : i32
    return %c0_i32, %arg1 : i32, i32
  }
  func.func @transform_4(%arg0: i32, %arg1: i32) -> (i32, i32) {
    %c0_i32 = arith.constant 0 : i32
    %c0_i32_0 = arith.constant 0 : i32
    return %c0_i32, %arg1 : i32, i32
  }
  func.func @transform_5(%arg0: i32, %arg1: i32) -> (i32, i32) {
    %c0_i32 = arith.constant 0 : i32
    return %arg0, %arg1 : i32, i32
  }
}

module attributes {stable_mosaic.version = 11 : i64} {
  func.func @_linear_residual_kernel(%arg0: i32, %arg1: i32, %arg2: memref<40x32xf32, #tpu.memory_space<vmem>>, %arg3: memref<32x128xbf16, #tpu.memory_space<vmem>>, %arg4: memref<1x128xf32, #tpu.memory_space<vmem>>, %arg5: memref<40x128xf32, #tpu.memory_space<vmem>>, %arg6: memref<40x128xf32, #tpu.memory_space<vmem>>) attributes {dimension_semantics = [#tpu.dimension_semantics<parallel>, #tpu.dimension_semantics<parallel>], iteration_bounds = array<i64: 1, 1>, scalar_prefetch = 0 : i64, scratch_operands = 0 : i64, tpu.core_type = #tpu.core_type<tc>, window_params = [{transform_indices = @transform_0, window_bounds = array<i64: 40, 32>}, {transform_indices = @transform_1, window_bounds = array<i64: 32, 128>}, {transform_indices = @transform_2, window_bounds = array<i64: 1, 128>}, {transform_indices = @transform_3, window_bounds = array<i64: 40, 128>}, {transform_indices = @transform_4, window_bounds = array<i64: 40, 128>}]} {
    %c0 = arith.constant 0 : index
    %c0_0 = arith.constant 0 : index
    %0 = vector.load %arg2[%c0, %c0_0] : memref<40x32xf32, #tpu.memory_space<vmem>>, vector<40x32xf32>
    %1 = arith.truncf %0 : vector<40x32xf32> to vector<40x32xbf16>
    %c0_1 = arith.constant 0 : index
    %c0_2 = arith.constant 0 : index
    %2 = vector.load %arg3[%c0_1, %c0_2] : memref<32x128xbf16, #tpu.memory_space<vmem>>, vector<32x128xbf16>
    %cst = arith.constant dense<0.000000e+00> : vector<40x128xf32>
    %3 = tpu.matmul %1, %2, %cst {dimension_numbers = #tpu.dot_dimension_numbers<[1], [0], [0], [1], [0, 0, 1, 1], [], []>} : vector<40x32xbf16>, vector<32x128xbf16>, vector<40x128xf32> -> vector<40x128xf32>
    %c0_3 = arith.constant 0 : index
    %c0_4 = arith.constant 0 : index
    %4 = vector.load %arg4[%c0_3, %c0_4] : memref<1x128xf32, #tpu.memory_space<vmem>>, vector<1x128xf32>
    %5 = vector.broadcast %4 : vector<1x128xf32> to vector<40x128xf32>
    %6 = arith.addf %3, %5 : vector<40x128xf32>
    %c0_5 = arith.constant 0 : index
    %c0_6 = arith.constant 0 : index
    %7 = vector.load %arg5[%c0_5, %c0_6] : memref<40x128xf32, #tpu.memory_space<vmem>>, vector<40x128xf32>
    %8 = arith.addf %6, %7 : vector<40x128xf32>
    %c0_7 = arith.constant 0 : index
    %c0_8 = arith.constant 0 : index
    %9 = vector.load %arg6[%c0_7, %c0_8] : memref<40x128xf32, #tpu.memory_space<vmem>>, vector<40x128xf32>
    tpu.vector_store %arg6[%c0_7, %c0_8], %8 {strides = array<i32>} : memref<40x128xf32, #tpu.memory_space<vmem>>, vector<40x128xf32>,
    return
  }
  func.func @transform_0(%arg0: i32, %arg1: i32) -> (i32, i32) {
    %c0_i32 = arith.constant 0 : i32
    %c0_i32_0 = arith.constant 0 : i32
    return %arg0, %c0_i32 : i32, i32
  }
  func.func @transform_1(%arg0: i32, %arg1: i32) -> (i32, i32) {
    %c0_i32 = arith.constant 0 : i32
    %c0_i32_0 = arith.constant 0 : i32
    return %c0_i32, %arg1 : i32, i32
  }
  func.func @transform_2(%arg0: i32, %arg1: i32) -> (i32, i32) {
    %c0_i32 = arith.constant 0 : i32
    %c0_i32_0 = arith.constant 0 : i32
    return %c0_i32, %arg1 : i32, i32
  }
  func.func @transform_3(%arg0: i32, %arg1: i32) -> (i32, i32) {
    %c0_i32 = arith.constant 0 : i32
    return %arg0, %arg1 : i32, i32
  }
  func.func @transform_4(%arg0: i32, %arg1: i32) -> (i32, i32) {
    %c0_i32 = arith.constant 0 : i32
    return %arg0, %arg1 : i32, i32
  }
}

module attributes {stable_mosaic.version = 11 : i64} {
  func.func @_ln_linear_kernel(%arg0: i32, %arg1: i32, %arg2: memref<40x32xf32, #tpu.memory_space<vmem>>, %arg3: memref<1x32xf32, #tpu.memory_space<vmem>>, %arg4: memref<1x32xf32, #tpu.memory_space<vmem>>, %arg5: memref<32x128xbf16, #tpu.memory_space<vmem>>, %arg6: memref<1x128xf32, #tpu.memory_space<vmem>>, %arg7: memref<40x128xf32, #tpu.memory_space<vmem>>) attributes {dimension_semantics = [#tpu.dimension_semantics<parallel>, #tpu.dimension_semantics<parallel>], iteration_bounds = array<i64: 1, 1>, scalar_prefetch = 0 : i64, scratch_operands = 0 : i64, tpu.core_type = #tpu.core_type<tc>, window_params = [{transform_indices = @transform_0, window_bounds = array<i64: 40, 32>}, {pipeline_mode = #tpu.pipeline_mode<synchronous>, transform_indices = @transform_1, window_bounds = array<i64: 1, 32>}, {pipeline_mode = #tpu.pipeline_mode<synchronous>, transform_indices = @transform_2, window_bounds = array<i64: 1, 32>}, {transform_indices = @transform_3, window_bounds = array<i64: 32, 128>}, {transform_indices = @transform_4, window_bounds = array<i64: 1, 128>}, {transform_indices = @transform_5, window_bounds = array<i64: 40, 128>}]} {
    %c0 = arith.constant 0 : index
    %c0_0 = arith.constant 0 : index
    %0 = vector.load %arg2[%c0, %c0_0] : memref<40x32xf32, #tpu.memory_space<vmem>>, vector<40x32xf32>
    %cst = arith.constant dense<0.000000e+00> : vector<40xf32>
    %1 = vector.multi_reduction <add>, %0, %cst [1] : vector<40x32xf32> to vector<40xf32>
    %2 = vector.shape_cast %1 : vector<40xf32> to vector<40x1xf32>
    %cst_1 = arith.constant 3.200000e+01 : f32
    %3 = vector.broadcast %cst_1 : f32 to vector<40x1xf32>
    %4 = arith.divf %2, %3 : vector<40x1xf32>
    %5 = vector.broadcast %4 : vector<40x1xf32> to vector<40x32xf32>
    %6 = arith.subf %0, %5 : vector<40x32xf32>
    %7 = arith.mulf %6, %6 : vector<40x32xf32>
    %cst_2 = arith.constant dense<0.000000e+00> : vector<40xf32>
    %8 = vector.multi_reduction <add>, %7, %cst_2 [1] : vector<40x32xf32> to vector<40xf32>
    %9 = vector.shape_cast %8 : vector<40xf32> to vector<40x1xf32>
    %cst_3 = arith.constant 3.200000e+01 : f32
    %10 = vector.broadcast %cst_3 : f32 to vector<40x1xf32>
    %11 = arith.divf %9, %10 : vector<40x1xf32>
    %cst_4 = arith.constant 9.99999997E-7 : f32
    %12 = vector.broadcast %cst_4 : f32 to vector<40x1xf32>
    %13 = arith.addf %11, %12 : vector<40x1xf32>
    %14 = math.rsqrt %13 : vector<40x1xf32>
    %15 = vector.broadcast %14 : vector<40x1xf32> to vector<40x32xf32>
    %16 = arith.mulf %6, %15 : vector<40x32xf32>
    %c0_5 = arith.constant 0 : index
    %c0_6 = arith.constant 0 : index
    %17 = vector.load %arg3[%c0_5, %c0_6] : memref<1x32xf32, #tpu.memory_space<vmem>>, vector<1x32xf32>
    %18 = vector.broadcast %17 : vector<1x32xf32> to vector<40x32xf32>
    %19 = arith.mulf %16, %18 : vector<40x32xf32>
    %c0_7 = arith.constant 0 : index
    %c0_8 = arith.constant 0 : index
    %20 = vector.load %arg4[%c0_7, %c0_8] : memref<1x32xf32, #tpu.memory_space<vmem>>, vector<1x32xf32>
    %21 = vector.broadcast %20 : vector<1x32xf32> to vector<40x32xf32>
    %22 = arith.addf %19, %21 : vector<40x32xf32>
    %23 = arith.truncf %22 : vector<40x32xf32> to vector<40x32xbf16>
    %c0_9 = arith.constant 0 : index
    %c0_10 = arith.constant 0 : index
    %24 = vector.load %arg5[%c0_9, %c0_10] : memref<32x128xbf16, #tpu.memory_space<vmem>>, vector<32x128xbf16>
    %cst_11 = arith.constant dense<0.000000e+00> : vector<40x128xf32>
    %25 = tpu.matmul %23, %24, %cst_11 {dimension_numbers = #tpu.dot_dimension_numbers<[1], [0], [0], [1], [0, 0, 1, 1], [], []>} : vector<40x32xbf16>, vector<32x128xbf16>, vector<40x128xf32> -> vector<40x128xf32>
    %c0_12 = arith.constant 0 : index
    %c0_13 = arith.constant 0 : index
    %26 = vector.load %arg6[%c0_12, %c0_13] : memref<1x128xf32, #tpu.memory_space<vmem>>, vector<1x128xf32>
    %27 = vector.broadcast %26 : vector<1x128xf32> to vector<40x128xf32>
    %28 = arith.addf %25, %27 : vector<40x128xf32>
    %29 = math.absf %28 : vector<40x128xf32>
    %cst_14 = arith.constant 0.707106769 : f32
    %30 = vector.broadcast %cst_14 : f32 to vector<40x128xf32>
    %31 = arith.mulf %29, %30 : vector<40x128xf32>
    %cst_15 = arith.constant 0.327591091 : f32
    %32 = vector.broadcast %cst_15 : f32 to vector<40x128xf32>
    %33 = arith.mulf %32, %31 : vector<40x128xf32>
    %cst_16 = arith.constant 1.000000e+00 : f32
    %34 = vector.broadcast %cst_16 : f32 to vector<40x128xf32>
    %35 = arith.addf %34, %33 : vector<40x128xf32>
    %cst_17 = arith.constant 1.000000e+00 : f32
    %36 = vector.broadcast %cst_17 : f32 to vector<40x128xf32>
    %37 = arith.divf %36, %35 : vector<40x128xf32>
    %cst_18 = arith.constant 1.06140542 : f32
    %38 = vector.broadcast %cst_18 : f32 to vector<40x128xf32>
    %39 = arith.mulf %38, %37 : vector<40x128xf32>
    %cst_19 = arith.constant 1.45315206 : f32
    %40 = vector.broadcast %cst_19 : f32 to vector<40x128xf32>
    %41 = arith.subf %39, %40 : vector<40x128xf32>
    %42 = arith.mulf %41, %37 : vector<40x128xf32>
    %cst_20 = arith.constant 1.42141378 : f32
    %43 = vector.broadcast %cst_20 : f32 to vector<40x128xf32>
    %44 = arith.addf %42, %43 : vector<40x128xf32>
    %45 = arith.mulf %44, %37 : vector<40x128xf32>
    %cst_21 = arith.constant 0.284496725 : f32
    %46 = vector.broadcast %cst_21 : f32 to vector<40x128xf32>
    %47 = arith.subf %45, %46 : vector<40x128xf32>
    %48 = arith.mulf %47, %37 : vector<40x128xf32>
    %cst_22 = arith.constant 0.254829586 : f32
    %49 = vector.broadcast %cst_22 : f32 to vector<40x128xf32>
    %50 = arith.addf %48, %49 : vector<40x128xf32>
    %51 = arith.mulf %50, %37 : vector<40x128xf32>
    %cst_23 = arith.constant 0.000000e+00 : f32
    %52 = vector.broadcast %cst_23 : f32 to vector<40x128xf32>
    %53 = arith.subf %52, %31 : vector<40x128xf32>
    %54 = arith.mulf %53, %31 : vector<40x128xf32>
    %55 = math.exp %54 : vector<40x128xf32>
    %56 = arith.mulf %51, %55 : vector<40x128xf32>
    %cst_24 = arith.constant 1.000000e+00 : f32
    %57 = vector.broadcast %cst_24 : f32 to vector<40x128xf32>
    %58 = arith.subf %57, %56 : vector<40x128xf32>
    %cst_25 = arith.constant 0.000000e+00 : f32
    %59 = vector.broadcast %cst_25 : f32 to vector<40x128xf32>
    %60 = arith.cmpf oge, %28, %59 : vector<40x128xf32>
    %cst_26 = arith.constant 0.000000e+00 : f32
    %61 = vector.broadcast %cst_26 : f32 to vector<40x128xf32>
    %62 = arith.subf %61, %58 : vector<40x128xf32>
    %63 = arith.select %60, %58, %62 : vector<40x128xi1>, vector<40x128xf32>
    %cst_27 = arith.constant 5.000000e-01 : f32
    %64 = vector.broadcast %cst_27 : f32 to vector<40x128xf32>
    %65 = arith.mulf %28, %64 : vector<40x128xf32>
    %cst_28 = arith.constant 1.000000e+00 : f32
    %66 = vector.broadcast %cst_28 : f32 to vector<40x128xf32>
    %67 = arith.addf %66, %63 : vector<40x128xf32>
    %68 = arith.mulf %65, %67 : vector<40x128xf32>
    %c0_29 = arith.constant 0 : index
    %c0_30 = arith.constant 0 : index
    %69 = vector.load %arg7[%c0_29, %c0_30] : memref<40x128xf32, #tpu.memory_space<vmem>>, vector<40x128xf32>
    tpu.vector_store %arg7[%c0_29, %c0_30], %68 {strides = array<i32>} : memref<40x128xf32, #tpu.memory_space<vmem>>, vector<40x128xf32>,
    return
  }
  func.func @transform_0(%arg0: i32, %arg1: i32) -> (i32, i32) {
    %c0_i32 = arith.constant 0 : i32
    %c0_i32_0 = arith.constant 0 : i32
    return %arg0, %c0_i32 : i32, i32
  }
  func.func @transform_1(%arg0: i32, %arg1: i32) -> (i32, i32) {
    %c0_i32 = arith.constant 0 : i32
    %c0_i32_0 = arith.constant 0 : i32
    %c0_i32_1 = arith.constant 0 : i32
    return %c0_i32, %c0_i32_0 : i32, i32
  }
  func.func @transform_2(%arg0: i32, %arg1: i32) -> (i32, i32) {
    %c0_i32 = arith.constant 0 : i32
    %c0_i32_0 = arith.constant 0 : i32
    %c0_i32_1 = arith.constant 0 : i32
    return %c0_i32, %c0_i32_0 : i32, i32
  }
  func.func @transform_3(%arg0: i32, %arg1: i32) -> (i32, i32) {
    %c0_i32 = arith.constant 0 : i32
    %c0_i32_0 = arith.constant 0 : i32
    return %c0_i32, %arg1 : i32, i32
  }
  func.func @transform_4(%arg0: i32, %arg1: i32) -> (i32, i32) {
    %c0_i32 = arith.constant 0 : i32
    %c0_i32_0 = arith.constant 0 : i32
    return %c0_i32, %arg1 : i32, i32
  }
  func.func @transform_5(%arg0: i32, %arg1: i32) -> (i32, i32) {
    %c0_i32 = arith.constant 0 : i32
    return %arg0, %arg1 : i32, i32
  }
}

module attributes {stable_mosaic.version = 11 : i64} {
  func.func @_linear_residual_kernel(%arg0: i32, %arg1: i32, %arg2: memref<40x128xf32, #tpu.memory_space<vmem>>, %arg3: memref<128x128xbf16, #tpu.memory_space<vmem>>, %arg4: memref<1x128xf32, #tpu.memory_space<vmem>>, %arg5: memref<40x128xf32, #tpu.memory_space<vmem>>, %arg6: memref<40x128xf32, #tpu.memory_space<vmem>>) attributes {dimension_semantics = [#tpu.dimension_semantics<parallel>, #tpu.dimension_semantics<parallel>], iteration_bounds = array<i64: 1, 1>, scalar_prefetch = 0 : i64, scratch_operands = 0 : i64, tpu.core_type = #tpu.core_type<tc>, window_params = [{transform_indices = @transform_0, window_bounds = array<i64: 40, 128>}, {transform_indices = @transform_1, window_bounds = array<i64: 128, 128>}, {transform_indices = @transform_2, window_bounds = array<i64: 1, 128>}, {transform_indices = @transform_3, window_bounds = array<i64: 40, 128>}, {transform_indices = @transform_4, window_bounds = array<i64: 40, 128>}]} {
    %c0 = arith.constant 0 : index
    %c0_0 = arith.constant 0 : index
    %0 = vector.load %arg2[%c0, %c0_0] : memref<40x128xf32, #tpu.memory_space<vmem>>, vector<40x128xf32>
    %1 = arith.truncf %0 : vector<40x128xf32> to vector<40x128xbf16>
    %c0_1 = arith.constant 0 : index
    %c0_2 = arith.constant 0 : index
    %2 = vector.load %arg3[%c0_1, %c0_2] : memref<128x128xbf16, #tpu.memory_space<vmem>>, vector<128x128xbf16>
    %cst = arith.constant dense<0.000000e+00> : vector<40x128xf32>
    %3 = tpu.matmul %1, %2, %cst {dimension_numbers = #tpu.dot_dimension_numbers<[1], [0], [0], [1], [0, 0, 1, 1], [], []>} : vector<40x128xbf16>, vector<128x128xbf16>, vector<40x128xf32> -> vector<40x128xf32>
    %c0_3 = arith.constant 0 : index
    %c0_4 = arith.constant 0 : index
    %4 = vector.load %arg4[%c0_3, %c0_4] : memref<1x128xf32, #tpu.memory_space<vmem>>, vector<1x128xf32>
    %5 = vector.broadcast %4 : vector<1x128xf32> to vector<40x128xf32>
    %6 = arith.addf %3, %5 : vector<40x128xf32>
    %c0_5 = arith.constant 0 : index
    %c0_6 = arith.constant 0 : index
    %7 = vector.load %arg5[%c0_5, %c0_6] : memref<40x128xf32, #tpu.memory_space<vmem>>, vector<40x128xf32>
    %8 = arith.addf %6, %7 : vector<40x128xf32>
    %c0_7 = arith.constant 0 : index
    %c0_8 = arith.constant 0 : index
    %9 = vector.load %arg6[%c0_7, %c0_8] : memref<40x128xf32, #tpu.memory_space<vmem>>, vector<40x128xf32>
    tpu.vector_store %arg6[%c0_7, %c0_8], %8 {strides = array<i32>} : memref<40x128xf32, #tpu.memory_space<vmem>>, vector<40x128xf32>,
    return
  }
  func.func @transform_0(%arg0: i32, %arg1: i32) -> (i32, i32) {
    %c0_i32 = arith.constant 0 : i32
    %c0_i32_0 = arith.constant 0 : i32
    return %arg0, %c0_i32 : i32, i32
  }
  func.func @transform_1(%arg0: i32, %arg1: i32) -> (i32, i32) {
    %c0_i32 = arith.constant 0 : i32
    %c0_i32_0 = arith.constant 0 : i32
    return %c0_i32, %arg1 : i32, i32
  }
  func.func @transform_2(%arg0: i32, %arg1: i32) -> (i32, i32) {
    %c0_i32 = arith.constant 0 : i32
    %c0_i32_0 = arith.constant 0 : i32
    return %c0_i32, %arg1 : i32, i32
  }
  func.func @transform_3(%arg0: i32, %arg1: i32) -> (i32, i32) {
    %c0_i32 = arith.constant 0 : i32
    return %arg0, %arg1 : i32, i32
  }
  func.func @transform_4(%arg0: i32, %arg1: i32) -> (i32, i32) {
    %c0_i32 = arith.constant 0 : i32
    return %arg0, %arg1 : i32, i32
  }
}

module attributes {stable_mosaic.version = 11 : i64} {
  func.func @_ln_linear_kernel(%arg0: i32, %arg1: i32, %arg2: memref<8x32xf32, #tpu.memory_space<vmem>>, %arg3: memref<1x32xf32, #tpu.memory_space<vmem>>, %arg4: memref<1x32xf32, #tpu.memory_space<vmem>>, %arg5: memref<32x128xbf16, #tpu.memory_space<vmem>>, %arg6: memref<1x128xf32, #tpu.memory_space<vmem>>, %arg7: memref<8x128xf32, #tpu.memory_space<vmem>>) attributes {dimension_semantics = [#tpu.dimension_semantics<parallel>, #tpu.dimension_semantics<parallel>], iteration_bounds = array<i64: 1, 1>, scalar_prefetch = 0 : i64, scratch_operands = 0 : i64, tpu.core_type = #tpu.core_type<tc>, window_params = [{transform_indices = @transform_0, window_bounds = array<i64: 8, 32>}, {pipeline_mode = #tpu.pipeline_mode<synchronous>, transform_indices = @transform_1, window_bounds = array<i64: 1, 32>}, {pipeline_mode = #tpu.pipeline_mode<synchronous>, transform_indices = @transform_2, window_bounds = array<i64: 1, 32>}, {transform_indices = @transform_3, window_bounds = array<i64: 32, 128>}, {transform_indices = @transform_4, window_bounds = array<i64: 1, 128>}, {transform_indices = @transform_5, window_bounds = array<i64: 8, 128>}]} {
    %c0 = arith.constant 0 : index
    %c0_0 = arith.constant 0 : index
    %0 = vector.load %arg2[%c0, %c0_0] : memref<8x32xf32, #tpu.memory_space<vmem>>, vector<8x32xf32>
    %cst = arith.constant dense<0.000000e+00> : vector<8xf32>
    %1 = vector.multi_reduction <add>, %0, %cst [1] : vector<8x32xf32> to vector<8xf32>
    %2 = vector.shape_cast %1 : vector<8xf32> to vector<8x1xf32>
    %cst_1 = arith.constant 3.200000e+01 : f32
    %3 = vector.broadcast %cst_1 : f32 to vector<8x1xf32>
    %4 = arith.divf %2, %3 : vector<8x1xf32>
    %5 = vector.broadcast %4 : vector<8x1xf32> to vector<8x32xf32>
    %6 = arith.subf %0, %5 : vector<8x32xf32>
    %7 = arith.mulf %6, %6 : vector<8x32xf32>
    %cst_2 = arith.constant dense<0.000000e+00> : vector<8xf32>
    %8 = vector.multi_reduction <add>, %7, %cst_2 [1] : vector<8x32xf32> to vector<8xf32>
    %9 = vector.shape_cast %8 : vector<8xf32> to vector<8x1xf32>
    %cst_3 = arith.constant 3.200000e+01 : f32
    %10 = vector.broadcast %cst_3 : f32 to vector<8x1xf32>
    %11 = arith.divf %9, %10 : vector<8x1xf32>
    %cst_4 = arith.constant 9.99999997E-7 : f32
    %12 = vector.broadcast %cst_4 : f32 to vector<8x1xf32>
    %13 = arith.addf %11, %12 : vector<8x1xf32>
    %14 = math.rsqrt %13 : vector<8x1xf32>
    %15 = vector.broadcast %14 : vector<8x1xf32> to vector<8x32xf32>
    %16 = arith.mulf %6, %15 : vector<8x32xf32>
    %c0_5 = arith.constant 0 : index
    %c0_6 = arith.constant 0 : index
    %17 = vector.load %arg3[%c0_5, %c0_6] : memref<1x32xf32, #tpu.memory_space<vmem>>, vector<1x32xf32>
    %18 = vector.broadcast %17 : vector<1x32xf32> to vector<8x32xf32>
    %19 = arith.mulf %16, %18 : vector<8x32xf32>
    %c0_7 = arith.constant 0 : index
    %c0_8 = arith.constant 0 : index
    %20 = vector.load %arg4[%c0_7, %c0_8] : memref<1x32xf32, #tpu.memory_space<vmem>>, vector<1x32xf32>
    %21 = vector.broadcast %20 : vector<1x32xf32> to vector<8x32xf32>
    %22 = arith.addf %19, %21 : vector<8x32xf32>
    %23 = arith.truncf %22 : vector<8x32xf32> to vector<8x32xbf16>
    %c0_9 = arith.constant 0 : index
    %c0_10 = arith.constant 0 : index
    %24 = vector.load %arg5[%c0_9, %c0_10] : memref<32x128xbf16, #tpu.memory_space<vmem>>, vector<32x128xbf16>
    %cst_11 = arith.constant dense<0.000000e+00> : vector<8x128xf32>
    %25 = tpu.matmul %23, %24, %cst_11 {dimension_numbers = #tpu.dot_dimension_numbers<[1], [0], [0], [1], [0, 0, 1, 1], [], []>} : vector<8x32xbf16>, vector<32x128xbf16>, vector<8x128xf32> -> vector<8x128xf32>
    %c0_12 = arith.constant 0 : index
    %c0_13 = arith.constant 0 : index
    %26 = vector.load %arg6[%c0_12, %c0_13] : memref<1x128xf32, #tpu.memory_space<vmem>>, vector<1x128xf32>
    %27 = vector.broadcast %26 : vector<1x128xf32> to vector<8x128xf32>
    %28 = arith.addf %25, %27 : vector<8x128xf32>
    %c0_14 = arith.constant 0 : index
    %c0_15 = arith.constant 0 : index
    %29 = vector.load %arg7[%c0_14, %c0_15] : memref<8x128xf32, #tpu.memory_space<vmem>>, vector<8x128xf32>
    tpu.vector_store %arg7[%c0_14, %c0_15], %28 {strides = array<i32>} : memref<8x128xf32, #tpu.memory_space<vmem>>, vector<8x128xf32>,
    return
  }
  func.func @transform_0(%arg0: i32, %arg1: i32) -> (i32, i32) {
    %c0_i32 = arith.constant 0 : i32
    %c0_i32_0 = arith.constant 0 : i32
    return %arg0, %c0_i32 : i32, i32
  }
  func.func @transform_1(%arg0: i32, %arg1: i32) -> (i32, i32) {
    %c0_i32 = arith.constant 0 : i32
    %c0_i32_0 = arith.constant 0 : i32
    %c0_i32_1 = arith.constant 0 : i32
    return %c0_i32, %c0_i32_0 : i32, i32
  }
  func.func @transform_2(%arg0: i32, %arg1: i32) -> (i32, i32) {
    %c0_i32 = arith.constant 0 : i32
    %c0_i32_0 = arith.constant 0 : i32
    %c0_i32_1 = arith.constant 0 : i32
    return %c0_i32, %c0_i32_0 : i32, i32
  }
  func.func @transform_3(%arg0: i32, %arg1: i32) -> (i32, i32) {
    %c0_i32 = arith.constant 0 : i32
    %c0_i32_0 = arith.constant 0 : i32
    return %c0_i32, %arg1 : i32, i32
  }
  func.func @transform_4(%arg0: i32, %arg1: i32) -> (i32, i32) {
    %c0_i32 = arith.constant 0 : i32
    %c0_i32_0 = arith.constant 0 : i32
    return %c0_i32, %arg1 : i32, i32
  }
  func.func @transform_5(%arg0: i32, %arg1: i32) -> (i32, i32) {
    %c0_i32 = arith.constant 0 : i32
    return %arg0, %arg1 : i32, i32
  }
}

</mosaic_0001>

<bundles_post_ra>
// kernel: vit_forward.12
= control target key start
LH: loop header
LB: loop body
LE: loop exit
PB: predicated region body
PF: predicated region fallthrough
CT: control target
= control target key end

     0   :  { %vm52_vm0 = vcmask 392192   ;;  %s196_s1 = inlined_call_operand.vmem [shape: bf16[48,128], index: 1, kind: input, shape index: {}]   ;;  %s197_s0 = inlined_call_operand.vmem [shape: f32[32,48], index: 0, kind: input, shape index: {}]   ;;  %s198_s2 = inlined_call_operand.vmem [shape: f32[1,128], index: 2, kind: input, shape index: {}]   ;;  %s199_s3 = inlined_call_operand.vmem [shape: f32[32,128], index: 3, kind: output, shape index: {}]  }
   0x1   :  { %v137_v0 = vld [vmem:[%s196_s1] sm:$0xff]   ;;  %v138_v1 = vld [vmem:[%s196_s1 + $0x8] sm:$0xff]   ;;  %v139_v4 = vld [vmem:[%s196_s1 + $0x10] sm:$0xff]  }
   0x2   :  { %127 = vmatprep.subr.bf16.mxu0 %v137_v0  ;;  %v15_v2 = vld [vmem:[%s197_s0] sm:$0xff]  ;;  %v16_v3 = vld [vmem:[%s197_s0 + $0x8] sm:$0xff]  ;;  %v17_v6 = vld [vmem:[%s197_s0 + $0x10] sm:$0xff] }
   0x3   :  { %128 = vmatpush3.bf16.msra.mxu0 %v137_v0  ;;  %v19_v5 = vpack.c.bf16 %v16_v3, %v15_v2  ;;  %v18_v7 = vld [vmem:[%s197_s0 + $0x18] sm:$0xff]  ;;  %v116_v9 = vld [vmem:[%s198_s2] ss:$0 sm:$0xff] }
   0x4   :  { %129 = vmatprep.subr.bf16.mxu0 %v138_v1  ;;  %v20_v8 = vpack.c.bf16 %v18_v7, %v17_v6 }
   0x5   :  { %133 = vmatprep.mubr.msk.bf16.mxu0 %vm52_vm0, %v19_v5 }
   0x7   :  { %130 = vmatpush3.bf16.msra.mxu0 %v138_v1 }
   0x8   :  { %131 = vmatprep.subr.bf16.mxu0 %v139_v4 }
   0xb   :  { %132 = vmatpush3.bf16.msra.mxu0 %v139_v4 }
   0xe   :  { %134 = vmatmul.mubr.msk.bf16.vlgmr.msra.gmra.mrb[0].mxu0 %vm52_vm0, %v20_v8 }
  0xe1   :  { %v135_v10 = vpop.f32.mrb[0].mxu0 }
  0xe2   :  { %v102_v11 = vadd.f32 %v135_v10, %v116_v9  ;;  %v93_v12 = vpop.f32.mrb[1].mxu0 }
  0xe3   :  { %v94_v13 = vadd.f32 %v116_v9, %v93_v12  ;;  %v136_v14 = vpop.f32.mrb[2].mxu0 }
  0xe4   :  { %110 = vst [vmem:[%s199_s3 + $0x10] sm:$0xff] %v102_v11  ;;  %v105_v15 = vadd.f32 %v136_v14, %v116_v9  ;;  %v96_v16 = vpop.f32.mrb[3].mxu0 }
  0xe5   :  { %108 = vst [vmem:[%s199_s3] sm:$0xff] %v94_v13  ;;  %v97_v17 = vadd.f32 %v116_v9, %v96_v16 }
  0xe6   :  { %111 = vst [vmem:[%s199_s3 + $0x18] sm:$0xff] %v105_v15 }
  0xe7   :  { %109 = vst [vmem:[%s199_s3 + $0x8] sm:$0xff] %v97_v17 }

// kernel: vit_forward.13
= control target key start
LH: loop header
LB: loop body
LE: loop exit
PB: predicated region body
PF: predicated region fallthrough
CT: control target
= control target key end

     0   :  { %vm26_vm0 = vcmask 261120   ;;  %v264_v36 = vmov 0.0   ;;  %vm265_vm1 = vmmov 0   ;;  %s372_s0 = inlined_call_operand.vmem [shape: f32[40,32], index: 0, kind: input, shape index: {}]   ;;  %s373_s3 = inlined_call_operand.vmem [shape: bf16[32,128], index: 3, kind: input, shape index: {}]   ;;  %s374_s1 = inlined_call_operand.vmem [shape: f32[1,32], index: 1, kind: input, shape index: {}]   ;;  %s375_s2 = inlined_call_operand.vmem [shape: f32[1,32], index: 2, kind: input, shape index: {}]   ;;  %s376_s4 = inlined_call_operand.vmem [shape: f32[1,128], index: 4, kind: input, shape index: {}]   ;;  %s377_s5 = inlined_call_operand.vmem [shape: f32[40,128], index: 5, kind: output, shape index: {}]  }
   0x1   :  { %v23_v0 = vld [vmem:[%s372_s0 + $0x10] sm:$0xff]  ;;  %v24_v1 = vld [vmem:[%s372_s0 + $0x18] sm:$0xff]  ;;  %v21_v2 = vld [vmem:[%s372_s0] sm:$0xff]  ;;  %246 = vmatprep.subr.bf16.mxu1 %v264_v36  ;;  %230 = vmatprep.subr.bf16.mxu0 %v264_v36 }
   0x2   :  { %v33_v3 = vsel %vm26_vm0, %v23_v0, 0.0  ;;  %v27_v4 = vsel %vm26_vm0, %v21_v2, 0.0  ;;  %v22_v5 = vld [vmem:[%s372_s0 + $0x8] sm:$0xff]  ;;  %v36_v6 = vsel %vm26_vm0, %v24_v1, 0.0  ;;  %v25_v8 = vld [vmem:[%s372_s0 + $0x20] sm:$0xff]  ;;  %238 = vmatprep.mubr.msk.bf16.mxu1 %vm265_vm1, %v264_v36  ;;  %234 = vmatprep.mubr.msk.bf16.mxu0 %vm265_vm1, %v264_v36 }
   0x3   :  { %34 = vadd.xlane.f32.xlu0 %v33_v3  ;;  %28 = vadd.xlane.f32.xlu1 %v27_v4  ;;  %v30_v7 = vsel %vm26_vm0, %v22_v5, 0.0  ;;  %v39_v9 = vsel %vm26_vm0, %v25_v8, 0.0  ;;  %v252_v35 = vld [vmem:[%s373_s3] sm:$0xff]   ;;  %v253_v37 = vld [vmem:[%s373_s3 + $0x8] sm:$0xff]  }
   0x4   :  { %248 = vmatpush3.bf16.msra.mxu1 %v252_v35  ;;  %231 = vmatpush3.bf16.msra.mxu0 %v252_v35  ;;  %v217_v55 = vld [vmem:[%s374_s1] ss:$0 sm:$0xff] }
   0x5   :  { %247 = vmatprep.subr.bf16.mxu1 %v264_v36  ;;  %232 = vmatprep.subr.bf16.mxu0 %v264_v36  ;;  %v218_v61 = vld [vmem:[%s375_s2] ss:$0 sm:$0xff] }
   0x7   :  { %37 = vadd.xlane.f32.xlu0 %v36_v6  ;;  %31 = vadd.xlane.f32.xlu1 %v30_v7 }
   0x8   :  { %249 = vmatpush3.bf16.msra.mxu1 %v253_v37  ;;  %233 = vmatpush3.bf16.msra.mxu0 %v253_v37 }
   0xb   :  { %40 = vadd.xlane.f32.xlu0 %v39_v9 }
  0x90   :  { %v35_v10 = vpop.xlane.xlu0 %34  ;;  %v29_v11 = vpop.xlane.xlu1 %28 }
  0x91   :  { %v45_v12 = vmul.f32 0.03125, %v35_v10  ;;  %v43_v13 = vmul.f32 0.03125, %v29_v11 }
  0x93   :  { %v316_v14 = vsub.f32 %v23_v0, %v45_v12  ;;  %v318_v15 = vsub.f32 %v21_v2, %v43_v13 }
  0x94   :  { %v38_v16 = vpop.xlane.xlu0 %37  ;;  %v32_v17 = vpop.xlane.xlu1 %31 }
  0x95   :  { %v46_v18 = vmul.f32 0.03125, %v38_v16  ;;  %v55_v19 = vmul.f32 %v316_v14, %v316_v14  ;;  %v44_v20 = vmul.f32 0.03125, %v32_v17  ;;  %v53_v21 = vmul.f32 %v318_v15, %v318_v15 }
  0x97   :  { %v51_v22 = vsub.f32 %v24_v1, %v46_v18  ;;  %v64_v23 = vsel %vm26_vm0, %v55_v19, 0.0  ;;  %v325_v24 = vsub.f32 %v22_v5, %v44_v20  ;;  %v58_v28 = vsel %vm26_vm0, %v53_v21, 0.0 }
  0x98   :  { %v41_v25 = vpop.xlane.xlu0 %40  ;;  %65 = vadd.xlane.f32.xlu1 %v64_v23 }
  0x99   :  { %v47_v26 = vmul.f32 0.03125, %v41_v25  ;;  %v56_v27 = vmul.f32 %v51_v22, %v51_v22  ;;  %v54_v29 = vmul.f32 %v325_v24, %v325_v24 }
  0x9b   :  { %v52_v30 = vsub.f32 %v25_v8, %v47_v26  ;;  %v67_v31 = vsel %vm26_vm0, %v56_v27, 0.0  ;;  %v61_v33 = vsel %vm26_vm0, %v54_v29, 0.0 }
  0x9c   :  { %68 = vadd.xlane.f32.xlu0 %v67_v31  ;;  %59 = vadd.xlane.f32.xlu1 %v58_v28 }
  0x9d   :  { %v57_v32 = vmul.f32 %v52_v30, %v52_v30 }
  0x9f   :  { %v70_v34 = vsel %vm26_vm0, %v57_v32, 0.0 }
  0xa0   :  { %71 = vadd.xlane.f32.xlu1 %v70_v34  ;;  %62 = vadd.xlane.f32.xlu0 %v61_v33 }
 0x125   :  { %v66_v38 = vpop.xlane.xlu1 %65 }
 0x126   :  { %v75_v39 = vmul.f32 0.03125, %v66_v38 }
 0x128   :  { %v80_v40 = vadd.f32 1e-06, %v75_v39 }
 0x129   :  { %v69_v41 = vpop.xlane.xlu0 %68  ;;  %v60_v42 = vpop.xlane.xlu1 %59 }
 0x12a   :  { %254 = vrsqrt.f32 %v80_v40  ;;  %v76_v43 = vmul.f32 0.03125, %v69_v41  ;;  %v73_v44 = vmul.f32 0.03125, %v60_v42 }
 0x12c   :  { %v81_v45 = vadd.f32 1e-06, %v76_v43  ;;  %v78_v46 = vadd.f32 1e-06, %v73_v44 }
 0x12d   :  { %v63_v47 = vpop.xlane.xlu0 %62  ;;  %v72_v48 = vpop.xlane.xlu1 %71 }
 0x12e   :  { %256 = vrsqrt.f32 %v81_v45  ;;  %v74_v49 = vmul.f32 0.03125, %v63_v47  ;;  %v77_v50 = vmul.f32 0.03125, %v72_v48 }
 0x12f   :  { %258 = vrsqrt.f32 %v78_v46 }
 0x130   :  { %v79_v51 = vadd.f32 1e-06, %v74_v49  ;;  %v82_v52 = vadd.f32 1e-06, %v77_v50 }
 0x132   :  { %260 = vrsqrt.f32 %v79_v51 }
 0x133   :  { %262 = vrsqrt.f32 %v82_v52 }
 0x134   :  { %v255_v53 = vpop.eup %254 }
 0x135   :  { %v90_v54 = vmul.f32 %v255_v53, %v316_v14  ;;  %v219_v14 = vld [vmem:[%s376_s4] ss:$0 sm:$0xff] }
 0x137   :  { %v102_v59 = vmul.f32 %v217_v55, %v90_v54 }
 0x138   :  { %v257_v56 = vpop.eup %256 }
 0x139   :  { %v259_v57 = vpop.eup %258  ;;  %v91_v58 = vmul.f32 %v257_v56, %v51_v22  ;;  %v114_v2 = vadd.f32 %v218_v61, %v102_v59 }
 0x13a   :  { %v88_v60 = vmul.f32 %v259_v57, %v318_v15 }
 0x13b   :  { %v103_v62 = vmul.f32 %v217_v55, %v91_v58 }
 0x13c   :  { %v261_v63 = vpop.eup %260  ;;  %v100_v4 = vmul.f32 %v217_v55, %v88_v60 }
 0x13d   :  { %v263_v0 = vpop.eup %262  ;;  %v89_v1 = vmul.f32 %v261_v63, %v325_v24  ;;  %v115_v3 = vadd.f32 %v218_v61, %v103_v62 }
 0x13e   :  { %v92_v5 = vmul.f32 %v263_v0, %v52_v30  ;;  %v112_v9 = vadd.f32 %v218_v61, %v100_v4 }
 0x13f   :  { %v118_v6 = vpack.c.bf16 %v115_v3, %v114_v2  ;;  %v101_v7 = vmul.f32 %v217_v55, %v89_v1 }
 0x140   :  { %v104_v8 = vmul.f32 %v217_v55, %v92_v5 }
 0x141   :  { %239 = vmatmul.mubr.msk.bf16.vlgmr.msra.gmra.mrb[0].mxu1 %vm26_vm0, %v118_v6  ;;  %v113_v10 = vadd.f32 %v218_v61, %v101_v7 }
 0x142   :  { %242 = vmatprep.mubr.msk.bf16.mxu1 %vm265_vm1, %v264_v36  ;;  %v116_v12 = vadd.f32 %v218_v61, %v104_v8 }
 0x143   :  { %v117_v11 = vpack.c.bf16 %v113_v10, %v112_v9 }
 0x144   :  { %v119_v13 = vpack.c.bf16 %v116_v12, %v116_v12 }
 0x145   :  { %235 = vmatmul.mubr.msk.bf16.vlgmr.msra.gmra.mrb[0].mxu0 %vm26_vm0, %v117_v11 }
 0x149   :  { %243 = vmatmul.mubr.msk.bf16.gmra.mrb[4].mxu1 %vm26_vm0, %v119_v13 }
 0x214   :  { %v194_v15 = vpop.f32.mrb[0].mxu1 }
 0x215   :  { %v195_v16 = vadd.f32 %v219_v14, %v194_v15  ;;  %v240_v17 = vpop.f32.mrb[1].mxu1 }
 0x216   :  { %v197_v18 = vpop.f32.mrb[2].mxu1 }
 0x217   :  { %210 = vst [vmem:[%s377_s5 + $0x10] sm:$0xff] %v195_v16  ;;  %v198_v19 = vadd.f32 %v219_v14, %v197_v18  ;;  %v241_v20 = vpop.f32.mrb[3].mxu1 }
 0x218   :  { %v186_v21 = vpop.f32.mrb[0].mxu0 }
 0x219   :  { %211 = vst [vmem:[%s377_s5 + $0x18] sm:$0xff] %v198_v19  ;;  %v187_v22 = vadd.f32 %v219_v14, %v186_v21  ;;  %v236_v23 = vpop.f32.mrb[1].mxu0 }
 0x21a   :  { %v189_v24 = vpop.f32.mrb[2].mxu0 }
 0x21b   :  { %208 = vst [vmem:[%s377_s5] sm:$0xff] %v187_v22  ;;  %v190_v25 = vadd.f32 %v219_v14, %v189_v24  ;;  %v237_v26 = vpop.f32.mrb[3].mxu0 }
 0x21c   :  { %v202_v27 = vpop.f32.mrb[4].mxu1 }
 0x21d   :  { %209 = vst [vmem:[%s377_s5 + $0x8] sm:$0xff] %v190_v25  ;;  %v203_v28 = vadd.f32 %v219_v14, %v202_v27  ;;  %v244_v29 = vpop.f32.mrb[5].mxu1 }
 0x21e   :  { %v205_v30 = vpop.f32.mrb[6].mxu1 }
 0x21f   :  { %212 = vst [vmem:[%s377_s5 + $0x20] sm:$0xff] %v203_v28  ;;  %v245_v31 = vpop.f32.mrb[7].mxu1 }

// kernel: vit_forward.14
= control target key start
LH: loop header
LB: loop body
LE: loop exit
PB: predicated region body
PF: predicated region fallthrough
CT: control target
= control target key end

     0   :  { %s1135_s6 = smov 0   ;;  %s1319_s0 = inlined_call_operand.vmem [shape: f32[2,17,96], index: 0, kind: input, shape index: {}]   ;;  %s1320_s1 = inlined_call_operand.vmem [shape: f32[2,17,32], index: 1, kind: output, shape index: {}]  }
   0x1 LB: > { %s901_s7 = sadd.s32 4294967295, %s1108_s6   ;;  %p905_p0 = scmp.ge.s32.totalorder %s1108_s6, 1  ;;  %s1108_s6 = sphi %s1135_s6, %s11_s6  }
   0x2   : > { %p87_p1 = scmp.lt.s32.totalorder %s1108_s6, 3 }
   0x4   : > { %p88_p2 = pnand %p905_p0, %p87_p1 }
   0x5   : > { %p107_p3 = scmp.lt.s32.totalorder (!%p88_p2), %s901_s7, 1  ;;  %s1110_s12 = smov (!%p88_p2), 96   ;;  %vm134_vm0 = vcmask (!%p88_p2), 64512   ;;  %vm237_vm1 = vcmask (!%p88_p2), 1040384   ;;  %v1112_v15 = vmov (!%p88_p2), 0   ;;  %vm202_vm2 = vcmask (!%p88_p2), 131072  }
   0x6   : > { %91 = sbr.rel (%p88_p2) target bundleno = 2044 (0x7fc), region = 24  ;;  %s1111_s13 = smov (!%p88_p2), 64   ;;  %v1171_v16 = vsel (!%p88_p2), %vm237_vm1, 65535, %v1112_v15  ;;  %vm195_vm3 = vcmask (!%p88_p2), 138240   ;;  %vm833_vm4 = vcmask (!%p88_p2), 130048   ;;  %vm837_vm5 = vcmask (!%p88_p2), 195584  }
   0x7   : > { %s1113_s14 = smov (!%p88_p2), 88   ;;  %s1114_s15 = smov (!%p88_p2), 120   ;;  %vm841_vm6 = vcmask (!%p88_p2), 261120   ;;  %vm844_vm7 = vcmask (!%p88_p2), 253952  }
   0x8   : > { %s1115_s16 = smov (!%p88_p2), 56   ;;  %s1116_s17 = smov (!%p88_p2), 80  }
   0x9   : > { %s1117_s18 = smov (!%p88_p2), 112   ;;  %s1118_s19 = smov (!%p88_p2), 48  }
   0xa   : > { %s1119_s20 = smov (!%p88_p2), 72   ;;  %s1120_s21 = smov (!%p88_p2), 104  }
   0xb   : > { %s1121_s22 = smov (!%p88_p2), 40   ;;  %s1122_s23 = smov (!%p88_p2), 8  }
   0xc   : > { %s1123_s24 = smov (!%p88_p2), 16   ;;  %s1124_s25 = smov (!%p88_p2), 24  }
   0xd   : > { %s1322_s7 = smov (!%p107_p3, %s901_s7), 1 }
   0xe   : > { %s1030_s8 = smul.u32 24, %s1322_s7 }
  0x10   : > { %s111_s11 = scalar_lea.vmem %s1319_s0, %s1030_s8  ;;  %s116_s28 = scalar_lea.vmem %s1320_s1, %s1030_s8 }
  0x11   : > { %v118_v0 = vld [vmem:[%s111_s11] sm:$0xff]  ;;  %v119_v1 = vld [vmem:[%s111_s11 + $0x8] sm:$0xff]  ;;  %v120_v2 = vld [vmem:[%s111_s11 + $0x10] sm:$0x1] }
  0x12   : > { %v1151_v3 = vpack.c.bf16 %v119_v1, %v118_v0  ;;  %v121_v4 = vmul.f32 0.35355338, %v118_v0  ;;  %v122_v5 = vmul.f32 0.35355338, %v119_v1  ;;  %v1154_v6 = vpack.c.bf16 %v120_v2, %v120_v2 }
  0x13   : > { %v123_v12 = vmul.f32 0.35355338, %v120_v2 }
  0x14   : > { %130 = vrot.lane.b32.xlu0 %v1151_v3, %s1110_s12  ;;  %v1156_v7 = vpack.c.bf16 %v122_v5, %v121_v4  ;;  %226 = vrot.lane.b32.xlu1 %v1151_v3, %s1111_s13 }
  0x15   : > { %v1167_v13 = vpack.c.bf16 %v123_v12, %v123_v12 }
  0x16   : > { %962 = vmatprep.mubr.msk.bf16.mxu0 %vm134_vm0, %v1156_v7 }
  0x18   : > { %132 = vrot.lane.b32.xlu0 %v1154_v6, %s1110_s12  ;;  %228 = vrot.lane.b32.xlu1 %v1154_v6, %s1111_s13 }
  0x86   : > { %v131_v8 = vpop.permute.xlu0 %130  ;;  %v227_v14 = vpop.permute.xlu1 %226 }
  0x87   : > { %1022 = vmatprep.subr.msk.bf16.mxu0 %vm134_vm0, %v131_v8  ;;  %v142_v9 = vsel %vm134_vm0, %v131_v8, 0  ;;  %966 = vmatprep.subr.bf16.mxu1 %v227_v14 }
  0x88   : > { %959 = vmatpush3.bf16.xpose.msra.mxu0 %v142_v9  ;;  %967 = vmatpush3.bf16.msra.mxu1 %v227_v14 }
  0x8a   : > { %v133_v10 = vpop.permute.xlu0 %132  ;;  %v229_v17 = vpop.permute.xlu1 %228 }
  0x8b   : > { %1023 = vmatprep.subr.msk.bf16.mxu0 %vm134_vm0, %v133_v10  ;;  %v145_v11 = vsel %vm134_vm0, %v133_v10, 0  ;;  %v241_v18 = vand.u32 %v1171_v16, %v229_v17 }
  0x8d   : > { %968 = vmatprep.subr.bf16.mxu1 %v241_v18 }
  0x8e   : > { %969 = vmatpush3.bf16.msra.mxu1 %v241_v18 }
  0x90   : > { %961 = vmatpush3.bf16.xpose.msra.mxu0 %v145_v11 }
  0x97   : > { %963 = vmatmul.mubr.msk.bf16.vlgmr.msra.gmra.mrb[0].mxu0 %vm134_vm0, %v1167_v13 }
 0x16a   : > { %v964_v19 = vpop.f32.mrb[0].mxu0 }
 0x16b   : > { %v181_v20 = vpop.f32.mrb[1].mxu0  ;;  %v203_v21 = vsel %vm202_vm2, %v964_v19, -inf }
 0x16c   : > { %204 = vmax.xlane.f32.xlu0 %v203_v21  ;;  %v965_v22 = vpop.f32.mrb[2].mxu0  ;;  %v196_v23 = vsel %vm195_vm3, %v181_v20, -inf }
 0x16d   : > { %197 = vmax.xlane.f32.xlu1 %v196_v23  ;;  %v184_v24 = vpop.f32.mrb[3].mxu0 }
 0x16e   : > { %v199_v25 = vsel %vm195_vm3, %v184_v24, -inf }
 0x171   : > { %200 = vmax.xlane.f32.xlu1 %v199_v25 }
 0x182   : > { %303 = vrot.lane.b32.xlu1 %v1151_v3, %s1113_s14  ;;  %301 = vrot.lane.b32.xlu0 %v1167_v13, %s1114_s15 }
 0x186   : > { %305 = vrot.lane.b32.xlu1 %v1154_v6, %s1113_s14 }
 0x18a   : > { %299 = vrot.lane.b32.xlu1 %v1156_v7, %s1114_s15 }
 0x18e   : > { %396 = vrot.lane.b32.xlu1 %v1151_v3, %s1115_s16 }
 0x1f9   : > { %v205_v26 = vpop.xlane.xlu0 %204 }
 0x1fa   : > { %v208_v27 = vsub.f32 %v964_v19, %v205_v26  ;;  %v198_v28 = vpop.xlane.xlu1 %197 }
 0x1fb   : > { %v206_v29 = vsub.f32 %v181_v20, %v198_v28 }
 0x1fc   : > { %v213_v30 = vmul.f32 1.442695, %v208_v27 }
 0x1fd   : > { %v209_v31 = vmul.f32 1.442695, %v206_v29  ;;  %v302_v45 = vpop.permute.xlu0 %301 }
 0x1fe   : > { %v201_v32 = vpop.xlane.xlu1 %200  ;;  %1054 = vpow2.f32 %v213_v30 }
 0x1ff   : > { %v207_v33 = vsub.f32 %v184_v24, %v201_v32  ;;  %1056 = vpow2.f32 %v209_v31 }
 0x201   : > { %v211_v34 = vmul.f32 1.442695, %v207_v33 }
 0x202   : > { %v304_v35 = vpop.permute.xlu1 %303 }
 0x203   : > { %1058 = vpow2.f32 %v211_v34  ;;  %1024 = vmatprep.subr.msk.bf16.mxu1 %vm134_vm0, %v304_v35  ;;  %v314_v41 = vsel %vm134_vm0, %v304_v35, 0 }
 0x206   : > { %v306_v37 = vpop.permute.xlu1 %305 }
 0x207   : > { %v317_v44 = vsel %vm134_vm0, %v306_v37, 0 }
 0x208   : > { %v1184_v36 = vpop.eup %1054 }
 0x209   : > { %v1186_v38 = vpop.eup %1056  ;;  %v225_v42 = vpack.c.bf16 %v1184_v36, %v1184_v36 }
 0x20a   : > { %v300_v43 = vpop.permute.xlu1 %299 }
 0x20d   : > { %v1188_v39 = vpop.eup %1058 }
 0x20e   : > { %v224_v40 = vpack.c.bf16 %v1188_v39, %v1186_v38  ;;  %v397_v46 = vpop.permute.xlu1 %396 }
 0x20f   : > { %982 = vmatprep.subr.bf16.mxu0 %v397_v46 }
 0x210   : > { %970 = vmatprep.mubr.msk.bf16.mxu1 %vm195_vm3, %v224_v40  ;;  %983 = vmatpush3.bf16.msra.mxu0 %v397_v46 }
 0x211   : > { %971 = vmatmul.mubr.msk.bf16.vlgmr.msra.gmra.mrb[0].mxu1 %vm195_vm3, %v225_v42 }
 0x212   : > { %975 = vmatpush3.bf16.xpose.msra.mxu1 %v314_v41  ;;  %978 = vmatprep.mubr.msk.bf16.mxu1 %vm134_vm0, %v300_v43 }
 0x213   : > { %1025 = vmatprep.subr.msk.bf16.mxu1 %vm134_vm0, %v306_v37 }
 0x21a   : > { %977 = vmatpush3.bf16.xpose.msra.mxu1 %v317_v44 }
 0x221   : > { %979 = vmatmul.mubr.msk.bf16.vlgmr.msra.gmra.mrb[4].mxu1 %vm134_vm0, %v302_v45 }
 0x2e4   : > { %v1201_v47 = vpop.f32.mrb[0].mxu1 }
 0x2e5   : > { %v1203_v48 = vpop.f32.mrb[1].mxu1 }
 0x2e6   : > { %v973_v49 = vpop.f32.mrb[2].mxu1 }
 0x2e7   : > { %v1205_v50 = vpop.f32.mrb[3].mxu1 }
 0x2f4   : > { %v980_v51 = vpop.f32.mrb[4].mxu1 }
 0x2f5   : > { %v353_v52 = vpop.f32.mrb[5].mxu1  ;;  %v373_v53 = vsel %vm202_vm2, %v980_v51, -inf }
 0x2f6   : > { %374 = vmax.xlane.f32.xlu1 %v373_v53  ;;  %v981_v54 = vpop.f32.mrb[6].mxu1  ;;  %v367_v57 = vsel %vm195_vm3, %v353_v52, -inf }
 0x2f7   : > { %v356_v55 = vpop.f32.mrb[7].mxu1 }
 0x2f8   : > { %v370_v56 = vsel %vm195_vm3, %v356_v55, -inf }
 0x2f9   : > { %371 = vmax.xlane.f32.xlu0 %v370_v56 }
 0x2fa   : > { %368 = vmax.xlane.f32.xlu1 %v367_v57 }
 0x30b   : > { %468 = vrot.lane.b32.xlu1 %v1151_v3, %s1116_s17 }
 0x30f   : > { %398 = vrot.lane.b32.xlu0 %v1154_v6, %s1115_s16  ;;  %470 = vrot.lane.b32.xlu1 %v1154_v6, %s1116_s17 }
 0x313   : > { %464 = vrot.lane.b32.xlu1 %v1156_v7, %s1117_s18 }
 0x317   : > { %466 = vrot.lane.b32.xlu1 %v1167_v13, %s1117_s18 }
 0x31b   : > { %563 = vrot.lane.b32.xlu1 %v1154_v6, %s1118_s19 }
 0x383   : > { %v375_v58 = vpop.xlane.xlu1 %374 }
 0x384   : > { %v378_v59 = vsub.f32 %v980_v51, %v375_v58 }
 0x386   : > { %v383_v60 = vmul.f32 1.442695, %v378_v59  ;;  %v372_v61 = vpop.xlane.xlu0 %371 }
 0x387   : > { %v377_v62 = vsub.f32 %v356_v55, %v372_v61  ;;  %v369_v63 = vpop.xlane.xlu1 %368 }
 0x388   : > { %v376_v0 = vsub.f32 %v353_v52, %v369_v63  ;;  %1060 = vpow2.f32 %v383_v60 }
 0x389   : > { %v381_v1 = vmul.f32 1.442695, %v377_v62 }
 0x38a   : > { %v379_v2 = vmul.f32 1.442695, %v376_v0  ;;  %v399_v4 = vpop.permute.xlu0 %398 }
 0x38b   : > { %1062 = vpow2.f32 %v381_v1  ;;  %v408_v5 = vand.u32 %v399_v4, %v1171_v16  ;;  %v469_v8 = vpop.permute.xlu1 %468 }
 0x38c   : > { %1064 = vpow2.f32 %v379_v2  ;;  %v479_v15 = vsel %vm134_vm0, %v469_v8, 0 }
 0x38d   : > { %984 = vmatprep.subr.bf16.mxu0 %v408_v5 }
 0x38e   : > { %985 = vmatpush3.bf16.msra.mxu0 %v408_v5 }
 0x38f   : > { %1026 = vmatprep.subr.msk.bf16.mxu0 %vm134_vm0, %v469_v8  ;;  %v471_v9 = vpop.permute.xlu1 %470 }
 0x390   : > { %v482_v19 = vsel %vm134_vm0, %v471_v9, 0 }
 0x392   : > { %v1220_v10 = vpop.eup %1060 }
 0x393   : > { %v395_v17 = vpack.c.bf16 %v1220_v10, %v1220_v10  ;;  %v465_v18 = vpop.permute.xlu1 %464 }
 0x395   : > { %v1222_v11 = vpop.eup %1062 }
 0x396   : > { %v1224_v12 = vpop.eup %1064 }
 0x397   : > { %v394_v14 = vpack.c.bf16 %v1222_v11, %v1224_v12  ;;  %v467_v20 = vpop.permute.xlu1 %466 }
 0x399   : > { %986 = vmatprep.mubr.msk.bf16.mxu0 %vm195_vm3, %v394_v14  ;;  %v388_v14 = vsel %vm195_vm3, %v1222_v11, 0.0 }
 0x39a   : > { %987 = vmatmul.mubr.msk.bf16.vlgmr.msra.gmra.mrb[4].mxu0 %vm195_vm3, %v395_v17 }
 0x39b   : > { %991 = vmatpush3.bf16.xpose.msra.mxu0 %v479_v15  ;;  %994 = vmatprep.mubr.msk.bf16.mxu0 %vm134_vm0, %v465_v18  ;;  %v564_v32 = vpop.permute.xlu1 %563  ;;  %v391_v15 = vsel %vm202_vm2, %v1220_v10, 0.0 }
 0x39c   : > { %1027 = vmatprep.subr.msk.bf16.mxu0 %vm134_vm0, %v471_v9  ;;  %v573_v45 = vand.u32 %v564_v32, %v1171_v16  ;;  %v385_v9 = vsel %vm195_vm3, %v1224_v12, 0.0 }
 0x3a3   : > { %993 = vmatpush3.bf16.xpose.msra.mxu0 %v482_v19 }
 0x3aa   : > { %995 = vmatmul.mubr.msk.bf16.vlgmr.msra.gmra.mrb[8].mxu0 %vm134_vm0, %v467_v20 }
 0x46d   : > { %v1237_v21 = vpop.f32.mrb[4].mxu0 }
 0x46e   : > { %v1239_v22 = vpop.f32.mrb[5].mxu0 }
 0x46f   : > { %v989_v23 = vpop.f32.mrb[6].mxu0 }
 0x470   : > { %v1241_v24 = vpop.f32.mrb[7].mxu0 }
 0x47d   : > { %v996_v25 = vpop.f32.mrb[8].mxu0 }
 0x47e   : > { %v518_v26 = vpop.f32.mrb[9].mxu0  ;;  %v538_v27 = vsel %vm202_vm2, %v996_v25, -inf }
 0x47f   : > { %539 = vmax.xlane.f32.xlu0 %v538_v27  ;;  %v997_v28 = vpop.f32.mrb[10].mxu0  ;;  %v532_v31 = vsel %vm195_vm3, %v518_v26, -inf }
 0x480   : > { %v521_v29 = vpop.f32.mrb[11].mxu0 }
 0x481   : > { %v535_v30 = vsel %vm195_vm3, %v521_v29, -inf }
 0x482   : > { %536 = vmax.xlane.f32.xlu1 %v535_v30 }
 0x483   : > { %533 = vmax.xlane.f32.xlu0 %v532_v31 }
 0x493   : > { %633 = vrot.lane.b32.xlu1 %v1151_v3, %s1119_s20 }
 0x497   : > { %629 = vrot.lane.b32.xlu1 %v1156_v7, %s1120_s21 }
 0x499   : > { %561 = vrot.lane.b32.xlu0 %v1151_v3, %s1118_s19 }
 0x49d   : > { %635 = vrot.lane.b32.xlu0 %v1154_v6, %s1119_s20 }
 0x4a1   : > { %631 = vrot.lane.b32.xlu0 %v1167_v13, %s1120_s21 }
 0x50c   : > { %v540_v33 = vpop.xlane.xlu0 %539 }
 0x50d   : > { %v543_v34 = vsub.f32 %v996_v25, %v540_v33 }
 0x50f   : > { %v548_v35 = vmul.f32 1.442695, %v543_v34  ;;  %v537_v37 = vpop.xlane.xlu1 %536 }
 0x510   : > { %v542_v40 = vsub.f32 %v521_v29, %v537_v37  ;;  %v534_v41 = vpop.xlane.xlu0 %533 }
 0x511   : > { %v541_v42 = vsub.f32 %v518_v26, %v534_v41  ;;  %1066 = vpow2.f32 %v548_v35  ;;  %v218_v41 = vsel %vm195_vm3, %v1188_v39, 0.0 }
 0x512   : > { %v546_v43 = vmul.f32 1.442695, %v542_v40 }
 0x513   : > { %v544_v44 = vmul.f32 1.442695, %v541_v42  ;;  %v634_v13 = vpop.permute.xlu1 %633  ;;  %v221_v42 = vsel %vm202_vm2, %v1184_v36, 0.0 }
 0x514   : > { %1068 = vpow2.f32 %v546_v43  ;;  %v562_v7 = vpop.permute.xlu0 %561  ;;  %v644_v53 = vsel %vm134_vm0, %v634_v13, 0 }
 0x515   : > { %1070 = vpow2.f32 %v544_v44  ;;  %998 = vmatprep.subr.bf16.mxu1 %v562_v7 }
 0x516   : > { %999 = vmatpush3.bf16.msra.mxu1 %v562_v7 }
 0x517   : > { %1000 = vmatprep.subr.bf16.mxu1 %v573_v45  ;;  %v630_v55 = vpop.permute.xlu1 %629 }
 0x518   : > { %v636_v56 = vpop.permute.xlu0 %635 }
 0x519   : > { %v647_v57 = vsel %vm134_vm0, %v636_v56, 0 }
 0x51a   : > { %1001 = vmatpush3.bf16.msra.mxu1 %v573_v45 }
 0x51b   : > { %1028 = vmatprep.subr.msk.bf16.mxu1 %vm134_vm0, %v634_v13  ;;  %v1067_v46 = vpop.eup %1066 }
 0x51c   : > { %v560_v54 = vpack.c.bf16 %v1067_v46, %v1067_v46  ;;  %v632_v58 = vpop.permute.xlu0 %631 }
 0x51e   : > { %v1069_v49 = vpop.eup %1068 }
 0x51f   : > { %v1071_v51 = vpop.eup %1070  ;;  %v553_v18 = vsel %vm195_vm3, %v1069_v49, 0.0 }
 0x520   : > { %v559_v52 = vpack.c.bf16 %v1069_v49, %v1071_v51  ;;  %v550_v17 = vsel %vm195_vm3, %v1071_v51, 0.0 }
 0x522   : > { %1002 = vmatprep.mubr.msk.bf16.mxu1 %vm195_vm3, %v559_v52 }
 0x523   : > { %1003 = vmatmul.mubr.msk.bf16.vlgmr.msra.gmra.mrb[8].mxu1 %vm195_vm3, %v560_v54 }
 0x524   : > { %1007 = vmatpush3.bf16.xpose.msra.mxu1 %v644_v53  ;;  %1010 = vmatprep.mubr.msk.bf16.mxu1 %vm134_vm0, %v630_v55 }
 0x525   : > { %1029 = vmatprep.subr.msk.bf16.mxu1 %vm134_vm0, %v636_v56 }
 0x52c   : > { %1009 = vmatpush3.bf16.xpose.msra.mxu1 %v647_v57 }
 0x533   : > { %1011 = vmatmul.mubr.msk.bf16.vlgmr.msra.gmra.mrb[12].mxu1 %vm134_vm0, %v632_v58 }
 0x5f6   : > { %v1261_v59 = vpop.f32.mrb[8].mxu1 }
 0x5f7   : > { %v1263_v60 = vpop.f32.mrb[9].mxu1 }
 0x5f8   : > { %v1005_v61 = vpop.f32.mrb[10].mxu1 }
 0x5f9   : > { %v1265_v62 = vpop.f32.mrb[11].mxu1 }
 0x606   : > { %v1012_v63 = vpop.f32.mrb[12].mxu1 }
 0x607   : > { %v683_v0 = vpop.f32.mrb[13].mxu1  ;;  %v703_v1 = vsel %vm202_vm2, %v1012_v63, -inf }
 0x608   : > { %704 = vmax.xlane.f32.xlu0 %v703_v1  ;;  %v1013_v2 = vpop.f32.mrb[14].mxu1  ;;  %v697_v4 = vsel %vm195_vm3, %v683_v0, -inf }
 0x609   : > { %698 = vmax.xlane.f32.xlu1 %v697_v4  ;;  %v686_v5 = vpop.f32.mrb[15].mxu1 }
 0x60a   : > { %v700_v8 = vsel %vm195_vm3, %v686_v5, -inf }
 0x60c   : > { %701 = vmax.xlane.f32.xlu0 %v700_v8 }
 0x61a   : > { %726 = vrot.lane.b32.xlu1 %v1151_v3, %s1121_s22  ;;  %v556_v3 = vsel %vm202_vm2, %v1067_v46, 0.0 }
 0x622   : > { %728 = vrot.lane.b32.xlu0 %v1154_v6, %s1121_s22 }
 0x63e   : > { %386 = vadd.xlane.f32.xlu1 %v385_v9 }
 0x641   : > { %389 = vadd.xlane.f32.xlu0 %v388_v14 }
 0x642   : > { %392 = vadd.xlane.f32.xlu1 %v391_v15 }
 0x645   : > { %551 = vadd.xlane.f32.xlu0 %v550_v17 }
 0x646   : > { %554 = vadd.xlane.f32.xlu1 %v553_v18 }
 0x649   : > { %557 = vadd.xlane.f32.xlu0 %v556_v3 }
 0x695   : > { %v705_v6 = vpop.xlane.xlu0 %704 }
 0x696   : > { %v708_v12 = vsub.f32 %v1012_v63, %v705_v6  ;;  %v699_v19 = vpop.xlane.xlu1 %698 }
 0x697   : > { %v706_v20 = vsub.f32 %v683_v0, %v699_v19 }
 0x698   : > { %v713_v23 = vmul.f32 1.442695, %v708_v12 }
 0x699   : > { %v709_v11 = vmul.f32 1.442695, %v706_v20  ;;  %v702_v25 = vpop.xlane.xlu0 %701 }
 0x69a   : > { %v707_v26 = vsub.f32 %v686_v5, %v702_v25  ;;  %v727_v27 = vpop.permute.xlu1 %726 }
 0x69b   : > { %1072 = vpow2.f32 %v709_v11  ;;  %1014 = vmatprep.subr.bf16.mxu0 %v727_v27 }
 0x69c   : > { %v711_v10 = vmul.f32 1.442695, %v707_v26  ;;  %1015 = vmatpush3.bf16.msra.mxu0 %v727_v27  ;;  %1074 = vpow2.f32 %v713_v23 }
 0x69d   : > { %v729_v28 = vpop.permute.xlu0 %728 }
 0x69e   : > { %1076 = vpow2.f32 %v711_v10  ;;  %v738_v29 = vand.u32 %v729_v28, %v1171_v16  ;;  %v215_v16 = vsel %vm195_vm3, %v1186_v38, 0.0 }
 0x6a0   : > { %1016 = vmatprep.subr.bf16.mxu0 %v738_v29 }
 0x6a1   : > { %1017 = vmatpush3.bf16.msra.mxu0 %v738_v29 }
 0x6a5   : > { %v1073_v30 = vpop.eup %1072 }
 0x6a6   : > { %v715_v31 = vsel %vm195_vm3, %v1073_v30, 0.0  ;;  %v1075_v32 = vpop.eup %1074 }
 0x6a7   : > { %716 = vadd.xlane.f32.xlu1 %v715_v31  ;;  %v721_v37 = vsel %vm202_vm2, %v1075_v32, 0.0  ;;  %v725_v40 = vpack.c.bf16 %v1075_v32, %v1075_v32 }
 0x6a8   : > { %v1077_v33 = vpop.eup %1076 }
 0x6a9   : > { %v718_v34 = vsel %vm195_vm3, %v1077_v33, 0.0  ;;  %v724_v35 = vpack.c.bf16 %v1077_v33, %v1073_v30 }
 0x6aa   : > { %719 = vadd.xlane.f32.xlu0 %v718_v34 }
 0x6ab   : > { %722 = vadd.xlane.f32.xlu1 %v721_v37  ;;  %1018 = vmatprep.mubr.msk.bf16.mxu0 %vm195_vm3, %v724_v35 }
 0x6ac   : > { %1019 = vmatmul.mubr.msk.bf16.vlgmr.msra.gmra.mrb[12].mxu0 %vm195_vm3, %v725_v40 }
 0x6ae   : > { %216 = vadd.xlane.f32.xlu0 %v215_v16 }
 0x6af   : > { %219 = vadd.xlane.f32.xlu1 %v218_v41 }
 0x6b2   : > { %222 = vadd.xlane.f32.xlu0 %v221_v42 }
 0x6cb   : > { %v387_v43 = vpop.xlane.xlu1 %386 }
 0x6cc   : > { %1078 = vrcp.f32 %v387_v43 }
 0x6ce   : > { %v390_v44 = vpop.xlane.xlu0 %389 }
 0x6cf   : > { %1080 = vrcp.f32 %v390_v44  ;;  %v393_v7 = vpop.xlane.xlu1 %392 }
 0x6d0   : > { %1082 = vrcp.f32 %v393_v7 }
 0x6d2   : > { %v552_v45 = vpop.xlane.xlu0 %551 }
 0x6d3   : > { %1084 = vrcp.f32 %v552_v45  ;;  %v555_v13 = vpop.xlane.xlu1 %554 }
 0x6d4   : > { %1086 = vrcp.f32 %v555_v13 }
 0x6d6   : > { %v1079_v38 = vpop.eup %1078  ;;  %v558_v46 = vpop.xlane.xlu0 %557 }
 0x6d7   : > { %1088 = vrcp.f32 %v558_v46  ;;  %v461_v39 = vmul.f32 %v1079_v38, %v1239_v22 }
 0x6d9   : > { %v1081_v49 = vpop.eup %1080  ;;  %797 = vrot.lane.b32.xlu1 %v461_v39, %s1122_s23 }
 0x6da   : > { %v1083_v36 = vpop.eup %1082  ;;  %v462_v51 = vmul.f32 %v1081_v49, %v1241_v24 }
 0x6db   : > { %v463_v52 = vmul.f32 %v1083_v36, %v1237_v21 }
 0x6dc   : > { %799 = vrot.lane.b32.xlu0 %v462_v51, %s1122_s23 }
 0x6dd   : > { %v1085_v53 = vpop.eup %1084  ;;  %801 = vrot.lane.b32.xlu1 %v463_v52, %s1122_s23 }
 0x6de   : > { %v1087_v54 = vpop.eup %1086  ;;  %v626_v55 = vmul.f32 %v1085_v53, %v1263_v60 }
 0x6df   : > { %v627_v56 = vmul.f32 %v1087_v54, %v1265_v62 }
 0x6e1   : > { %v1089_v57 = vpop.eup %1088  ;;  %811 = vrot.lane.b32.xlu0 %v627_v56, %s1123_s24  ;;  %809 = vrot.lane.b32.xlu1 %v626_v55, %s1123_s24 }
 0x6e2   : > { %v628_v22 = vmul.f32 %v1089_v57, %v1261_v59 }
 0x6e5   : > { %813 = vrot.lane.b32.xlu1 %v628_v22, %s1123_s24 }
 0x734   : > { %v717_v58 = vpop.xlane.xlu1 %716 }
 0x735   : > { %1090 = vrcp.f32 %v717_v58 }
 0x737   : > { %v720_v61 = vpop.xlane.xlu0 %719 }
 0x738   : > { %v723_v24 = vpop.xlane.xlu1 %722  ;;  %1092 = vrcp.f32 %v720_v61 }
 0x739   : > { %1094 = vrcp.f32 %v723_v24 }
 0x73b   : > { %v217_v9 = vpop.xlane.xlu0 %216 }
 0x73c   : > { %v220_v59 = vpop.xlane.xlu1 %219  ;;  %1096 = vrcp.f32 %v217_v9 }
 0x73d   : > { %1098 = vrcp.f32 %v220_v59 }
 0x73f   : > { %v1091_v63 = vpop.eup %1090  ;;  %v223_v15 = vpop.xlane.xlu0 %222 }
 0x740   : > { %1100 = vrcp.f32 %v223_v15 }
 0x742   : > { %v1093_v2 = vpop.eup %1092 }
 0x743   : > { %v1095_v5 = vpop.eup %1094 }
 0x746   : > { %v1097_v6 = vpop.eup %1096 }
 0x747   : > { %v1099_v12 = vpop.eup %1098  ;;  %v294_v20 = vmul.f32 %v1097_v6, %v1203_v48 }
 0x748   : > { %v295_v26 = vmul.f32 %v1099_v12, %v1205_v50 }
 0x74a   : > { %v1101_v23 = vpop.eup %1100 }
 0x74b   : > { %v798_v14 = vpop.permute.xlu1 %797  ;;  %v296_v48 = vmul.f32 %v1101_v23, %v1201_v47 }
 0x74c   : > { %v830_v25 = vsel %vm134_vm0, %v294_v20, %v798_v14 }
 0x74e   : > { %v800_v18 = vpop.permute.xlu0 %799 }
 0x74f   : > { %v802_v17 = vpop.permute.xlu1 %801  ;;  %v831_v28 = vsel %vm134_vm0, %v295_v26, %v800_v18 }
 0x750   : > { %v832_v50 = vsel %vm134_vm0, %v296_v48, %v802_v17 }
 0x753   : > { %v810_v3 = vpop.permute.xlu1 %809  ;;  %v812_v19 = vpop.permute.xlu0 %811 }
 0x754   : > { %v834_v27 = vsel %vm833_vm4, %v830_v25, %v810_v3  ;;  %v835_v30 = vsel %vm833_vm4, %v831_v28, %v812_v19 }
 0x757   : > { %v814_v11 = vpop.permute.xlu1 %813 }
 0x758   : > { %v836_v33 = vsel %vm833_vm4, %v832_v50, %v814_v11 }
 0x77f   : > { %v1020_v21 = vpop.f32.mrb[12].mxu0 }
 0x780   : > { %v774_v0 = vpop.f32.mrb[13].mxu0  ;;  %v793_v8 = vmul.f32 %v1095_v5, %v1020_v21 }
 0x781   : > { %v791_v1 = vmul.f32 %v1091_v63, %v774_v0  ;;  %v1021_v60 = vpop.f32.mrb[14].mxu0 }
 0x782   : > { %v777_v62 = vpop.f32.mrb[15].mxu0 }
 0x783   : > { %v792_v4 = vmul.f32 %v1093_v2, %v777_v62  ;;  %821 = vrot.lane.b32.xlu0 %v791_v1, %s1124_s25 }
 0x785   : > { %823 = vrot.lane.b32.xlu1 %v792_v4, %s1124_s25 }
 0x787   : > { %825 = vrot.lane.b32.xlu0 %v793_v8, %s1124_s25 }
 0x7f5   : > { %v822_v10 = vpop.permute.xlu0 %821 }
 0x7f6   : > { %v838_v29 = vsel %vm837_vm5, %v834_v27, %v822_v10 }
 0x7f7   : > { %842 = vst.msk [vmem:[%s116_s28] sm:$0xff] %vm841_vm6, %v838_v29  ;;  %v824_v31 = vpop.permute.xlu1 %823 }
 0x7f8   : > { %v839_v32 = vsel %vm837_vm5, %v835_v30, %v824_v31 }
 0x7f9   : > { %843 = vst.msk [vmem:[%s116_s28 + $0x8] sm:$0xff] %vm841_vm6, %v839_v32  ;;  %v826_v34 = vpop.permute.xlu0 %825 }
 0x7fa   : > { %v840_v35 = vsel %vm837_vm5, %v836_v33, %v826_v34 }
 0x7fb   : > { %845 = vst.msk [vmem:[%s116_s28 + $0x10] sm:$0x1] %vm844_vm7, %v840_v35 }
 0x7fc PF: > { %s11_s6 = sadd.s32 1, %s1108_s6  }
 0x7fd   : > { %p8_p4 = scmp.ge.s32.totalorder %s11_s6, 4  }
 0x7ff   :  { %10 = sbr.rel (!%p8_p4) target bundleno = 1 (0x1), region = 54 }

// kernel: vit_forward.15
= control target key start
LH: loop header
LB: loop body
LE: loop exit
PB: predicated region body
PF: predicated region fallthrough
CT: control target
= control target key end

     0   :  { %v169_v0 = vmov 0.0   ;;  %vm170_vm0 = vmmov 0   ;;  %vm49_vm1 = vcmask 261120   ;;  %s253_s1 = inlined_call_operand.vmem [shape: bf16[32,128], index: 1, kind: input, shape index: {}]   ;;  %s254_s0 = inlined_call_operand.vmem [shape: f32[40,32], index: 0, kind: input, shape index: {}]   ;;  %s255_s2 = inlined_call_operand.vmem [shape: f32[1,128], index: 2, kind: input, shape index: {}]   ;;  %s256_s3 = inlined_call_operand.vmem [shape: f32[40,128], index: 3, kind: input, shape index: {}]   ;;  %s257_s4 = inlined_call_operand.vmem [shape: f32[40,128], index: 4, kind: output, shape index: {}]  }
   0x1   :  { %161 = vmatprep.subr.bf16.mxu1 %v169_v0  ;;  %v167_v1 = vld [vmem:[%s253_s1] sm:$0xff]   ;;  %145 = vmatprep.subr.bf16.mxu0 %v169_v0  ;;  %v168_v2 = vld [vmem:[%s253_s1 + $0x8] sm:$0xff]   ;;  %v20_v3 = vld [vmem:[%s254_s0 + $0x10] sm:$0xff] }
   0x2   :  { %153 = vmatprep.mubr.msk.bf16.mxu1 %vm170_vm0, %v169_v0  ;;  %149 = vmatprep.mubr.msk.bf16.mxu0 %vm170_vm0, %v169_v0  ;;  %v21_v4 = vld [vmem:[%s254_s0 + $0x18] sm:$0xff]  ;;  %v18_v5 = vld [vmem:[%s254_s0] sm:$0xff]  ;;  %v19_v6 = vld [vmem:[%s254_s0 + $0x8] sm:$0xff] }
   0x3   :  { %163 = vmatpush3.bf16.msra.mxu1 %v167_v1  ;;  %146 = vmatpush3.bf16.msra.mxu0 %v167_v1  ;;  %v24_v7 = vpack.c.bf16 %v21_v4, %v20_v3  ;;  %v23_v8 = vpack.c.bf16 %v19_v6, %v18_v5  ;;  %v22_v9 = vld [vmem:[%s254_s0 + $0x20] sm:$0xff]  ;;  %v117_v13 = vld [vmem:[%s256_s3 + $0x10] sm:$0xff]  ;;  %v118_v21 = vld [vmem:[%s256_s3 + $0x18] sm:$0xff] }
   0x4   :  { %162 = vmatprep.subr.bf16.mxu1 %v169_v0  ;;  %147 = vmatprep.subr.bf16.mxu0 %v169_v0  ;;  %v25_v10 = vpack.c.bf16 %v22_v9, %v22_v9  ;;  %v134_v11 = vld [vmem:[%s255_s2] ss:$0 sm:$0xff]  ;;  %v116_v23 = vld [vmem:[%s256_s3 + $0x8] sm:$0xff] }
   0x5   :  { %v115_v15 = vld [vmem:[%s256_s3] sm:$0xff] }
   0x6   :  { %v119_v33 = vld [vmem:[%s256_s3 + $0x20] sm:$0xff] }
   0x7   :  { %164 = vmatpush3.bf16.msra.mxu1 %v168_v2  ;;  %148 = vmatpush3.bf16.msra.mxu0 %v168_v2 }
   0xa   :  { %154 = vmatmul.mubr.msk.bf16.vlgmr.msra.gmra.mrb[0].mxu1 %vm49_vm1, %v24_v7  ;;  %150 = vmatmul.mubr.msk.bf16.vlgmr.msra.gmra.mrb[0].mxu0 %vm49_vm1, %v23_v8 }
   0xb   :  { %157 = vmatprep.mubr.msk.bf16.mxu1 %vm170_vm0, %v169_v0 }
  0x12   :  { %158 = vmatmul.mubr.msk.bf16.gmra.mrb[4].mxu1 %vm49_vm1, %v25_v10 }
  0xdd   :  { %v101_v12 = vpop.f32.mrb[0].mxu1  ;;  %v93_v14 = vpop.f32.mrb[0].mxu0 }
  0xde   :  { %v102_v16 = vadd.f32 %v134_v11, %v101_v12  ;;  %v155_v17 = vpop.f32.mrb[1].mxu1  ;;  %v94_v18 = vadd.f32 %v134_v11, %v93_v14  ;;  %v151_v19 = vpop.f32.mrb[1].mxu0 }
  0xdf   :  { %v104_v20 = vpop.f32.mrb[2].mxu1  ;;  %v96_v22 = vpop.f32.mrb[2].mxu0 }
  0xe0   :  { %v122_v24 = vadd.f32 %v117_v13, %v102_v16  ;;  %v105_v25 = vadd.f32 %v134_v11, %v104_v20  ;;  %v120_v26 = vadd.f32 %v115_v15, %v94_v18  ;;  %v156_v27 = vpop.f32.mrb[3].mxu1  ;;  %v97_v28 = vadd.f32 %v134_v11, %v96_v22  ;;  %v152_v29 = vpop.f32.mrb[3].mxu0 }
  0xe2   :  { %127 = vst [vmem:[%s257_s4 + $0x10] sm:$0xff] %v122_v24  ;;  %v123_v30 = vadd.f32 %v118_v21, %v105_v25  ;;  %125 = vst [vmem:[%s257_s4] sm:$0xff] %v120_v26  ;;  %v121_v31 = vadd.f32 %v116_v23, %v97_v28 }
  0xe4   :  { %128 = vst [vmem:[%s257_s4 + $0x18] sm:$0xff] %v123_v30  ;;  %126 = vst [vmem:[%s257_s4 + $0x8] sm:$0xff] %v121_v31 }
  0xe5   :  { %v109_v32 = vpop.f32.mrb[4].mxu1 }
  0xe6   :  { %v110_v34 = vadd.f32 %v134_v11, %v109_v32  ;;  %v159_v35 = vpop.f32.mrb[5].mxu1 }
  0xe7   :  { %v112_v36 = vpop.f32.mrb[6].mxu1 }
  0xe8   :  { %v124_v37 = vadd.f32 %v119_v33, %v110_v34  ;;  %v160_v38 = vpop.f32.mrb[7].mxu1 }
  0xea   :  { %129 = vst [vmem:[%s257_s4 + $0x20] sm:$0xff] %v124_v37 }

// kernel: vit_forward.16
= control target key start
LH: loop header
LB: loop body
LE: loop exit
PB: predicated region body
PF: predicated region fallthrough
CT: control target
= control target key end

     0   :  { %vm26_vm0 = vcmask 261120   ;;  %v429_v36 = vmov 0.0   ;;  %vm430_vm1 = vmmov 0   ;;  %s562_s0 = inlined_call_operand.vmem [shape: f32[40,32], index: 0, kind: input, shape index: {}]   ;;  %s563_s3 = inlined_call_operand.vmem [shape: bf16[32,128], index: 3, kind: input, shape index: {}]   ;;  %s564_s1 = inlined_call_operand.vmem [shape: f32[1,32], index: 1, kind: input, shape index: {}]   ;;  %s565_s2 = inlined_call_operand.vmem [shape: f32[1,32], index: 2, kind: input, shape index: {}]   ;;  %s566_s4 = inlined_call_operand.vmem [shape: f32[1,128], index: 4, kind: input, shape index: {}]   ;;  %s567_s5 = inlined_call_operand.vmem [shape: f32[40,128], index: 5, kind: output, shape index: {}]  }
   0x1   :  { %v23_v0 = vld [vmem:[%s562_s0 + $0x10] sm:$0xff]  ;;  %v24_v1 = vld [vmem:[%s562_s0 + $0x18] sm:$0xff]  ;;  %v21_v2 = vld [vmem:[%s562_s0] sm:$0xff]  ;;  %391 = vmatprep.subr.bf16.mxu1 %v429_v36  ;;  %375 = vmatprep.subr.bf16.mxu0 %v429_v36 }
   0x2   :  { %v33_v3 = vsel %vm26_vm0, %v23_v0, 0.0  ;;  %v27_v4 = vsel %vm26_vm0, %v21_v2, 0.0  ;;  %v22_v5 = vld [vmem:[%s562_s0 + $0x8] sm:$0xff]  ;;  %v36_v6 = vsel %vm26_vm0, %v24_v1, 0.0  ;;  %v25_v8 = vld [vmem:[%s562_s0 + $0x20] sm:$0xff]  ;;  %383 = vmatprep.mubr.msk.bf16.mxu1 %vm430_vm1, %v429_v36  ;;  %379 = vmatprep.mubr.msk.bf16.mxu0 %vm430_vm1, %v429_v36 }
   0x3   :  { %34 = vadd.xlane.f32.xlu0 %v33_v3  ;;  %28 = vadd.xlane.f32.xlu1 %v27_v4  ;;  %v30_v7 = vsel %vm26_vm0, %v22_v5, 0.0  ;;  %v39_v9 = vsel %vm26_vm0, %v25_v8, 0.0  ;;  %v397_v35 = vld [vmem:[%s563_s3] sm:$0xff]   ;;  %v398_v37 = vld [vmem:[%s563_s3 + $0x8] sm:$0xff]  }
   0x4   :  { %393 = vmatpush3.bf16.msra.mxu1 %v397_v35  ;;  %376 = vmatpush3.bf16.msra.mxu0 %v397_v35  ;;  %v352_v55 = vld [vmem:[%s564_s1] ss:$0 sm:$0xff] }
   0x5   :  { %392 = vmatprep.subr.bf16.mxu1 %v429_v36  ;;  %377 = vmatprep.subr.bf16.mxu0 %v429_v36  ;;  %v353_v61 = vld [vmem:[%s565_s2] ss:$0 sm:$0xff] }
   0x7   :  { %37 = vadd.xlane.f32.xlu0 %v36_v6  ;;  %31 = vadd.xlane.f32.xlu1 %v30_v7 }
   0x8   :  { %394 = vmatpush3.bf16.msra.mxu1 %v398_v37  ;;  %378 = vmatpush3.bf16.msra.mxu0 %v398_v37 }
   0xb   :  { %40 = vadd.xlane.f32.xlu0 %v39_v9 }
  0x90   :  { %v35_v10 = vpop.xlane.xlu0 %34  ;;  %v29_v11 = vpop.xlane.xlu1 %28 }
  0x91   :  { %v45_v12 = vmul.f32 0.03125, %v35_v10  ;;  %v43_v13 = vmul.f32 0.03125, %v29_v11 }
  0x93   :  { %v481_v14 = vsub.f32 %v23_v0, %v45_v12  ;;  %v483_v15 = vsub.f32 %v21_v2, %v43_v13 }
  0x94   :  { %v38_v16 = vpop.xlane.xlu0 %37  ;;  %v32_v17 = vpop.xlane.xlu1 %31 }
  0x95   :  { %v46_v18 = vmul.f32 0.03125, %v38_v16  ;;  %v55_v19 = vmul.f32 %v481_v14, %v481_v14  ;;  %v44_v20 = vmul.f32 0.03125, %v32_v17  ;;  %v53_v21 = vmul.f32 %v483_v15, %v483_v15 }
  0x97   :  { %v51_v22 = vsub.f32 %v24_v1, %v46_v18  ;;  %v64_v23 = vsel %vm26_vm0, %v55_v19, 0.0  ;;  %v490_v24 = vsub.f32 %v22_v5, %v44_v20  ;;  %v58_v28 = vsel %vm26_vm0, %v53_v21, 0.0 }
  0x98   :  { %v41_v25 = vpop.xlane.xlu0 %40  ;;  %65 = vadd.xlane.f32.xlu1 %v64_v23 }
  0x99   :  { %v47_v26 = vmul.f32 0.03125, %v41_v25  ;;  %v56_v27 = vmul.f32 %v51_v22, %v51_v22  ;;  %v54_v29 = vmul.f32 %v490_v24, %v490_v24 }
  0x9b   :  { %v52_v30 = vsub.f32 %v25_v8, %v47_v26  ;;  %v67_v31 = vsel %vm26_vm0, %v56_v27, 0.0  ;;  %v61_v33 = vsel %vm26_vm0, %v54_v29, 0.0 }
  0x9c   :  { %68 = vadd.xlane.f32.xlu0 %v67_v31  ;;  %59 = vadd.xlane.f32.xlu1 %v58_v28 }
  0x9d   :  { %v57_v32 = vmul.f32 %v52_v30, %v52_v30 }
  0x9f   :  { %v70_v34 = vsel %vm26_vm0, %v57_v32, 0.0 }
  0xa0   :  { %71 = vadd.xlane.f32.xlu1 %v70_v34  ;;  %62 = vadd.xlane.f32.xlu0 %v61_v33 }
 0x125   :  { %v66_v38 = vpop.xlane.xlu1 %65 }
 0x126   :  { %v75_v39 = vmul.f32 0.03125, %v66_v38 }
 0x128   :  { %v80_v40 = vadd.f32 1e-06, %v75_v39 }
 0x129   :  { %v69_v41 = vpop.xlane.xlu0 %68  ;;  %v60_v42 = vpop.xlane.xlu1 %59 }
 0x12a   :  { %399 = vrsqrt.f32 %v80_v40  ;;  %v76_v43 = vmul.f32 0.03125, %v69_v41  ;;  %v73_v44 = vmul.f32 0.03125, %v60_v42 }
 0x12c   :  { %v81_v45 = vadd.f32 1e-06, %v76_v43  ;;  %v78_v46 = vadd.f32 1e-06, %v73_v44 }
 0x12d   :  { %v63_v47 = vpop.xlane.xlu0 %62  ;;  %v72_v48 = vpop.xlane.xlu1 %71 }
 0x12e   :  { %401 = vrsqrt.f32 %v81_v45  ;;  %v74_v49 = vmul.f32 0.03125, %v63_v47  ;;  %v77_v50 = vmul.f32 0.03125, %v72_v48 }
 0x12f   :  { %403 = vrsqrt.f32 %v78_v46 }
 0x130   :  { %v79_v51 = vadd.f32 1e-06, %v74_v49  ;;  %v82_v52 = vadd.f32 1e-06, %v77_v50 }
 0x132   :  { %405 = vrsqrt.f32 %v79_v51 }
 0x133   :  { %407 = vrsqrt.f32 %v82_v52 }
 0x134   :  { %v400_v53 = vpop.eup %399 }
 0x135   :  { %v90_v54 = vmul.f32 %v400_v53, %v481_v14  ;;  %v354_v14 = vld [vmem:[%s566_s4] ss:$0 sm:$0xff] }
 0x137   :  { %v102_v59 = vmul.f32 %v352_v55, %v90_v54 }
 0x138   :  { %v402_v56 = vpop.eup %401 }
 0x139   :  { %v404_v57 = vpop.eup %403  ;;  %v91_v58 = vmul.f32 %v402_v56, %v51_v22  ;;  %v114_v2 = vadd.f32 %v353_v61, %v102_v59 }
 0x13a   :  { %v88_v60 = vmul.f32 %v404_v57, %v483_v15 }
 0x13b   :  { %v103_v62 = vmul.f32 %v352_v55, %v91_v58 }
 0x13c   :  { %v406_v63 = vpop.eup %405  ;;  %v100_v4 = vmul.f32 %v352_v55, %v88_v60 }
 0x13d   :  { %v408_v0 = vpop.eup %407  ;;  %v89_v1 = vmul.f32 %v406_v63, %v490_v24  ;;  %v115_v3 = vadd.f32 %v353_v61, %v103_v62 }
 0x13e   :  { %v92_v5 = vmul.f32 %v408_v0, %v52_v30  ;;  %v112_v9 = vadd.f32 %v353_v61, %v100_v4 }
 0x13f   :  { %v118_v6 = vpack.c.bf16 %v115_v3, %v114_v2  ;;  %v101_v7 = vmul.f32 %v352_v55, %v89_v1 }
 0x140   :  { %v104_v8 = vmul.f32 %v352_v55, %v92_v5 }
 0x141   :  { %384 = vmatmul.mubr.msk.bf16.vlgmr.msra.gmra.mrb[0].mxu1 %vm26_vm0, %v118_v6  ;;  %v113_v10 = vadd.f32 %v353_v61, %v101_v7 }
 0x142   :  { %387 = vmatprep.mubr.msk.bf16.mxu1 %vm430_vm1, %v429_v36  ;;  %v116_v12 = vadd.f32 %v353_v61, %v104_v8 }
 0x143   :  { %v117_v11 = vpack.c.bf16 %v113_v10, %v112_v9 }
 0x144   :  { %v119_v13 = vpack.c.bf16 %v116_v12, %v116_v12 }
 0x145   :  { %380 = vmatmul.mubr.msk.bf16.vlgmr.msra.gmra.mrb[0].mxu0 %vm26_vm0, %v117_v11 }
 0x149   :  { %388 = vmatmul.mubr.msk.bf16.gmra.mrb[4].mxu1 %vm26_vm0, %v119_v13 }
 0x214   :  { %v194_v15 = vpop.f32.mrb[0].mxu1 }
 0x215   :  { %v522_v16 = vadd.f32 %v354_v14, %v194_v15  ;;  %v385_v17 = vpop.f32.mrb[1].mxu1 }
 0x216   :  { %v197_v18 = vpop.f32.mrb[2].mxu1 }
 0x217   :  { %v210_v19 = vand.u32 2147483647, %v522_v16  ;;  %v525_v20 = vadd.f32 %v354_v14, %v197_v18  ;;  %v386_v21 = vpop.f32.mrb[3].mxu1  ;;  %vm315_vm2 = vcmp.ge.f32.partialorder %v522_v16, 0.0 }
 0x218   :  { %v186_v22 = vpop.f32.mrb[0].mxu0 }
 0x219   :  { %v215_v23 = vmul.f32 0.70710677, %v210_v19  ;;  %v211_v24 = vand.u32 2147483647, %v525_v20  ;;  %v528_v25 = vadd.f32 %v354_v14, %v186_v22  ;;  %v381_v26 = vpop.f32.mrb[1].mxu0  ;;  %vm316_vm3 = vcmp.ge.f32.partialorder %v525_v20, 0.0 }
 0x21a   :  { %v189_v29 = vpop.f32.mrb[2].mxu0 }
 0x21b   :  { %v220_v27 = vmul.f32 0.3275911, %v215_v23  ;;  %v216_v28 = vmul.f32 0.70710677, %v211_v24  ;;  %v208_v30 = vand.u32 2147483647, %v528_v25  ;;  %v531_v31 = vadd.f32 %v354_v14, %v189_v29 }
 0x21c   :  { %v382_v32 = vpop.f32.mrb[3].mxu0  ;;  %v202_v33 = vpop.f32.mrb[4].mxu1  ;;  %v285_v48 = vsub.f32 0.0, %v215_v23  ;;  %vm313_vm4 = vcmp.ge.f32.partialorder %v528_v25, 0.0 }
 0x21d   :  { %v225_v34 = vadd.f32 1.0, %v220_v27  ;;  %v221_v35 = vmul.f32 0.3275911, %v216_v28  ;;  %v389_v36 = vpop.f32.mrb[5].mxu1  ;;  %v213_v37 = vmul.f32 0.70710677, %v208_v30  ;;  %v534_v43 = vadd.f32 %v354_v14, %v202_v33 }
 0x21e   :  { %v209_v38 = vand.u32 2147483647, %v531_v31  ;;  %v205_v40 = vpop.f32.mrb[6].mxu1  ;;  %v290_v52 = vmul.f32 %v285_v48, %v215_v23  ;;  %v286_v53 = vsub.f32 0.0, %v216_v28  ;;  %vm314_vm5 = vcmp.ge.f32.partialorder %v531_v31, 0.0 }
 0x21f   :  { %409 = vrcp.f32 %v225_v34  ;;  %v226_v39 = vadd.f32 1.0, %v221_v35  ;;  %v218_v41 = vmul.f32 0.3275911, %v213_v37  ;;  %v390_v44 = vpop.f32.mrb[7].mxu1  ;;  %v212_v47 = vand.u32 2147483647, %v534_v43 }
 0x220   :  { %v214_v42 = vmul.f32 0.70710677, %v209_v38  ;;  %v283_v57 = vsub.f32 0.0, %v213_v37  ;;  %v297_v60 = vmul.f32 1.442695, %v290_v52  ;;  %v291_v61 = vmul.f32 %v286_v53, %v216_v28 }
 0x221   :  { %411 = vrcp.f32 %v226_v39  ;;  %v223_v45 = vadd.f32 1.0, %v218_v41  ;;  %v217_v50 = vmul.f32 0.70710677, %v212_v47  ;;  %vm317_vm6 = vcmp.ge.f32.partialorder %v534_v43, 0.0 }
 0x222   :  { %v219_v46 = vmul.f32 0.3275911, %v214_v42  ;;  %v284_v63 = vsub.f32 0.0, %v214_v42  ;;  %v288_v2 = vmul.f32 %v283_v57, %v213_v37  ;;  %v299_v6 = vmul.f32 1.442695, %v291_v61 }
 0x223   :  { %413 = vrcp.f32 %v223_v45  ;;  %v222_v51 = vmul.f32 0.3275911, %v217_v50  ;;  %v287_v11 = vsub.f32 0.0, %v217_v50 }
 0x224   :  { %v224_v49 = vadd.f32 1.0, %v219_v46  ;;  %v289_v10 = vmul.f32 %v284_v63, %v214_v42  ;;  %v293_v13 = vmul.f32 1.442695, %v288_v2 }
 0x225   :  { %v227_v55 = vadd.f32 1.0, %v222_v51  ;;  %v292_v26 = vmul.f32 %v287_v11, %v217_v50 }
 0x226   :  { %415 = vrcp.f32 %v224_v49  ;;  %v295_v24 = vmul.f32 1.442695, %v289_v10 }
 0x227   :  { %417 = vrcp.f32 %v227_v55  ;;  %v301_v38 = vmul.f32 1.442695, %v292_v26 }
 0x228   :  { %419 = vpow2.f32 %v297_v60 }
 0x229   :  { %v410_v54 = vpop.eup %409  ;;  %421 = vpow2.f32 %v299_v6 }
 0x22a   :  { %v240_v56 = vmul.f32 1.0614054, %v410_v54  ;;  %423 = vpow2.f32 %v293_v13 }
 0x22b   :  { %v412_v58 = vpop.eup %411  ;;  %425 = vpow2.f32 %v295_v24 }
 0x22c   :  { %v362_v59 = vadd.f32 -1.4531521, %v240_v56  ;;  %v241_v62 = vmul.f32 1.0614054, %v412_v58  ;;  %427 = vpow2.f32 %v301_v38 }
 0x22d   :  { %v414_v0 = vpop.eup %413 }
 0x22e   :  { %v250_v1 = vmul.f32 %v410_v54, %v362_v59  ;;  %v363_v3 = vadd.f32 -1.4531521, %v241_v62  ;;  %v238_v4 = vmul.f32 1.0614054, %v414_v0 }
 0x230   :  { %v255_v5 = vadd.f32 1.4214138, %v250_v1  ;;  %v416_v7 = vpop.eup %415  ;;  %v251_v8 = vmul.f32 %v412_v58, %v363_v3  ;;  %v360_v9 = vadd.f32 -1.4531521, %v238_v4  ;;  %v330_v4 = vmul.f32 0.5, %v522_v16 }
 0x231   :  { %v239_v14 = vmul.f32 1.0614054, %v416_v7  ;;  %v418_v21 = vpop.eup %417 }
 0x232   :  { %v260_v12 = vmul.f32 %v410_v54, %v255_v5  ;;  %v256_v15 = vadd.f32 1.4214138, %v251_v8  ;;  %v248_v17 = vmul.f32 %v414_v0, %v360_v9  ;;  %v242_v29 = vmul.f32 1.0614054, %v418_v21  ;;  %v420_v39 = vpop.eup %419 }
 0x233   :  { %v361_v19 = vadd.f32 -1.4531521, %v239_v14  ;;  %v422_v51 = vpop.eup %421 }
 0x234   :  { %v367_v18 = vadd.f32 -0.28449672, %v260_v12  ;;  %v261_v22 = vmul.f32 %v412_v58, %v256_v15  ;;  %v253_v23 = vadd.f32 1.4214138, %v248_v17  ;;  %v364_v35 = vadd.f32 -1.4531521, %v242_v29  ;;  %v424_v59 = vpop.eup %423 }
 0x235   :  { %v249_v28 = vmul.f32 %v416_v7, %v361_v19  ;;  %v331_v12 = vmul.f32 0.5, %v525_v20 }
 0x236   :  { %v270_v27 = vmul.f32 %v410_v54, %v367_v18  ;;  %v368_v30 = vadd.f32 -0.28449672, %v261_v22  ;;  %v258_v32 = vmul.f32 %v414_v0, %v253_v23  ;;  %v252_v42 = vmul.f32 %v418_v21, %v364_v35 }
 0x237   :  { %v254_v34 = vadd.f32 1.4214138, %v249_v28  ;;  %v328_v18 = vmul.f32 0.5, %v528_v25 }
 0x238   :  { %v275_v33 = vadd.f32 0.2548296, %v270_v27  ;;  %v271_v36 = vmul.f32 %v412_v58, %v368_v30  ;;  %v365_v37 = vadd.f32 -0.28449672, %v258_v32  ;;  %v257_v48 = vadd.f32 1.4214138, %v252_v42 }
 0x239   :  { %v259_v41 = vmul.f32 %v416_v7, %v254_v34  ;;  %v329_v27 = vmul.f32 0.5, %v531_v31  ;;  %v332_v32 = vmul.f32 0.5, %v534_v43 }
 0x23a   :  { %v280_v40 = vmul.f32 %v410_v54, %v275_v33  ;;  %v276_v44 = vadd.f32 0.2548296, %v271_v36  ;;  %v268_v45 = vmul.f32 %v414_v0, %v365_v37  ;;  %v262_v55 = vmul.f32 %v418_v21, %v257_v48 }
 0x23b   :  { %v366_v47 = vadd.f32 -0.28449672, %v259_v41 }
 0x23c   :  { %v305_v46 = vmul.f32 %v420_v39, %v280_v40  ;;  %v281_v49 = vmul.f32 %v412_v58, %v276_v44  ;;  %v273_v50 = vadd.f32 0.2548296, %v268_v45  ;;  %v369_v54 = vadd.f32 -0.28449672, %v262_v55  ;;  %v426_v58 = vpop.eup %425 }
 0x23d   :  { %v269_v53 = vmul.f32 %v416_v7, %v366_v47  ;;  %v428_v17 = vpop.eup %427 }
 0x23e   :  { %v310_v52 = vsub.f32 1.0, %v305_v46  ;;  %v306_v56 = vmul.f32 %v422_v51, %v281_v49  ;;  %v278_v57 = vmul.f32 %v414_v0, %v273_v50  ;;  %v272_v3 = vmul.f32 %v418_v21, %v369_v54 }
 0x23f   :  { %v274_v61 = vadd.f32 0.2548296, %v269_v53 }
 0x240   :  { %v320_v60 = vsub.f32 0.0, %v310_v52  ;;  %v311_v62 = vsub.f32 1.0, %v306_v56  ;;  %v303_v63 = vmul.f32 %v424_v59, %v278_v57  ;;  %v277_v9 = vadd.f32 0.2548296, %v272_v3 }
 0x241   :  { %v279_v2 = vmul.f32 %v416_v7, %v274_v61 }
 0x242   :  { %v325_v1 = vsel %vm315_vm2, %v310_v52, %v320_v60  ;;  %v321_v6 = vsub.f32 0.0, %v311_v62  ;;  %v308_v8 = vsub.f32 1.0, %v303_v63  ;;  %v282_v15 = vmul.f32 %v418_v21, %v277_v9 }
 0x243   :  { %v335_v5 = vadd.f32 1.0, %v325_v1  ;;  %v304_v0 = vmul.f32 %v426_v58, %v279_v2 }
 0x244   :  { %v326_v11 = vsel %vm316_vm3, %v311_v62, %v321_v6  ;;  %v318_v13 = vsub.f32 0.0, %v308_v8  ;;  %v307_v24 = vmul.f32 %v428_v17, %v282_v15 }
 0x245   :  { %v340_v10 = vmul.f32 %v335_v5, %v330_v4  ;;  %v336_v14 = vadd.f32 1.0, %v326_v11  ;;  %v309_v7 = vsub.f32 1.0, %v304_v0 }
 0x246   :  { %v323_v16 = vsel %vm313_vm4, %v308_v8, %v318_v13  ;;  %v312_v26 = vsub.f32 1.0, %v307_v24 }
 0x247   :  { %345 = vst [vmem:[%s567_s5 + $0x10] sm:$0xff] %v340_v10  ;;  %v341_v19 = vmul.f32 %v336_v14, %v331_v12  ;;  %v333_v22 = vadd.f32 1.0, %v323_v16  ;;  %v319_v23 = vsub.f32 0.0, %v309_v7 }
 0x248   :  { %v322_v25 = vsub.f32 0.0, %v312_v26 }
 0x249   :  { %346 = vst [vmem:[%s567_s5 + $0x18] sm:$0xff] %v341_v19  ;;  %v338_v20 = vmul.f32 %v333_v22, %v328_v18  ;;  %v324_v21 = vsel %vm314_vm5, %v309_v7, %v319_v23 }
 0x24a   :  { %v334_v28 = vadd.f32 1.0, %v324_v21  ;;  %v327_v30 = vsel %vm317_vm6, %v312_v26, %v322_v25 }
 0x24b   :  { %343 = vst [vmem:[%s567_s5] sm:$0xff] %v338_v20  ;;  %v337_v33 = vadd.f32 1.0, %v327_v30 }
 0x24c   :  { %v339_v29 = vmul.f32 %v334_v28, %v329_v27 }
 0x24d   :  { %v342_v34 = vmul.f32 %v337_v33, %v332_v32 }
 0x24e   :  { %344 = vst [vmem:[%s567_s5 + $0x8] sm:$0xff] %v339_v29 }
 0x24f   :  { %347 = vst [vmem:[%s567_s5 + $0x20] sm:$0xff] %v342_v34 }

// kernel: vit_forward.17
= control target key start
LH: loop header
LB: loop body
LE: loop exit
PB: predicated region body
PF: predicated region fallthrough
CT: control target
= control target key end

     0   :  { %v246_v0 = vmov 0.0   ;;  %vm247_vm0 = vmmov 0   ;;  %s348_s1 = inlined_call_operand.vmem [shape: bf16[128,128], index: 1, kind: input, shape index: {}]   ;;  %s349_s0 = inlined_call_operand.vmem [shape: f32[40,128], index: 0, kind: input, shape index: {}]   ;;  %s350_s2 = inlined_call_operand.vmem [shape: f32[1,128], index: 2, kind: input, shape index: {}]   ;;  %s351_s3 = inlined_call_operand.vmem [shape: f32[40,128], index: 3, kind: input, shape index: {}]   ;;  %s352_s4 = inlined_call_operand.vmem [shape: f32[40,128], index: 4, kind: output, shape index: {}]  }
   0x1   :  { %220 = vmatprep.subr.bf16.mxu1 %v246_v0  ;;  %v238_v1 = vld [vmem:[%s348_s1] sm:$0xff]   ;;  %192 = vmatprep.subr.bf16.mxu0 %v246_v0  ;;  %v239_v2 = vld [vmem:[%s348_s1 + $0x8] sm:$0xff]   ;;  %v240_v3 = vld [vmem:[%s348_s1 + $0x10] sm:$0xff]  }
   0x2   :  { %212 = vmatprep.mubr.msk.bf16.mxu1 %vm247_vm0, %v246_v0  ;;  %208 = vmatprep.mubr.msk.bf16.mxu0 %vm247_vm0, %v246_v0  ;;  %v241_v4 = vld [vmem:[%s348_s1 + $0x18] sm:$0xff]   ;;  %v242_v5 = vld [vmem:[%s348_s1 + $0x20] sm:$0xff]   ;;  %v243_v6 = vld [vmem:[%s348_s1 + $0x28] sm:$0xff]  }
   0x3   :  { %228 = vmatpush3.bf16.msra.mxu1 %v238_v1  ;;  %193 = vmatpush3.bf16.msra.mxu0 %v238_v1  ;;  %v244_v7 = vld [vmem:[%s348_s1 + $0x30] sm:$0xff]   ;;  %v245_v8 = vld [vmem:[%s348_s1 + $0x38] sm:$0xff]   ;;  %v18_v11 = vld [vmem:[%s349_s0] sm:$0xff] }
   0x4   :  { %221 = vmatprep.subr.bf16.mxu1 %v246_v0  ;;  %194 = vmatprep.subr.bf16.mxu0 %v246_v0  ;;  %v20_v9 = vld [vmem:[%s349_s0 + $0x10] sm:$0xff]  ;;  %v21_v10 = vld [vmem:[%s349_s0 + $0x18] sm:$0xff]  ;;  %v19_v12 = vld [vmem:[%s349_s0 + $0x8] sm:$0xff] }
   0x5   :  { %v24_v13 = vpack.c.bf16 %v21_v10, %v20_v9  ;;  %v23_v14 = vpack.c.bf16 %v19_v12, %v18_v11  ;;  %v22_v15 = vld [vmem:[%s349_s0 + $0x20] sm:$0xff]  ;;  %v155_v19 = vld [vmem:[%s351_s3 + $0x10] sm:$0xff]  ;;  %v156_v27 = vld [vmem:[%s351_s3 + $0x18] sm:$0xff] }
   0x6   :  { %v25_v16 = vpack.c.bf16 %v22_v15, %v22_v15  ;;  %v172_v17 = vld [vmem:[%s350_s2] ss:$0 sm:$0xff]  ;;  %v154_v29 = vld [vmem:[%s351_s3 + $0x8] sm:$0xff] }
   0x7   :  { %229 = vmatpush3.bf16.msra.mxu1 %v239_v2  ;;  %195 = vmatpush3.bf16.msra.mxu0 %v239_v2  ;;  %v153_v21 = vld [vmem:[%s351_s3] sm:$0xff] }
   0x8   :  { %222 = vmatprep.subr.bf16.mxu1 %v246_v0  ;;  %196 = vmatprep.subr.bf16.mxu0 %v246_v0  ;;  %v157_v39 = vld [vmem:[%s351_s3 + $0x20] sm:$0xff] }
   0xb   :  { %230 = vmatpush3.bf16.msra.mxu1 %v240_v3  ;;  %197 = vmatpush3.bf16.msra.mxu0 %v240_v3 }
   0xc   :  { %223 = vmatprep.subr.bf16.mxu1 %v246_v0  ;;  %198 = vmatprep.subr.bf16.mxu0 %v246_v0 }
   0xf   :  { %231 = vmatpush3.bf16.msra.mxu1 %v241_v4  ;;  %199 = vmatpush3.bf16.msra.mxu0 %v241_v4 }
  0x10   :  { %224 = vmatprep.subr.bf16.mxu1 %v246_v0  ;;  %200 = vmatprep.subr.bf16.mxu0 %v246_v0 }
  0x13   :  { %232 = vmatpush3.bf16.msra.mxu1 %v242_v5  ;;  %201 = vmatpush3.bf16.msra.mxu0 %v242_v5 }
  0x14   :  { %225 = vmatprep.subr.bf16.mxu1 %v246_v0  ;;  %202 = vmatprep.subr.bf16.mxu0 %v246_v0 }
  0x17   :  { %233 = vmatpush3.bf16.msra.mxu1 %v243_v6  ;;  %203 = vmatpush3.bf16.msra.mxu0 %v243_v6 }
  0x18   :  { %226 = vmatprep.subr.bf16.mxu1 %v246_v0  ;;  %204 = vmatprep.subr.bf16.mxu0 %v246_v0 }
  0x1b   :  { %234 = vmatpush3.bf16.msra.mxu1 %v244_v7  ;;  %205 = vmatpush3.bf16.msra.mxu0 %v244_v7 }
  0x1c   :  { %227 = vmatprep.subr.bf16.mxu1 %v246_v0  ;;  %206 = vmatprep.subr.bf16.mxu0 %v246_v0 }
  0x1f   :  { %235 = vmatpush3.bf16.msra.mxu1 %v245_v8  ;;  %207 = vmatpush3.bf16.msra.mxu0 %v245_v8 }
  0x22   :  { %213 = vmatmul.mubr.bf16.vlgmr.msra.gmra.mrb[0].mxu1 %v24_v13  ;;  %209 = vmatmul.mubr.bf16.vlgmr.msra.gmra.mrb[0].mxu0 %v23_v14 }
  0x23   :  { %216 = vmatprep.mubr.msk.bf16.mxu1 %vm247_vm0, %v246_v0 }
  0x2a   :  { %217 = vmatmul.mubr.bf16.gmra.mrb[4].mxu1 %v25_v16 }
  0xf5   :  { %v139_v18 = vpop.f32.mrb[0].mxu1  ;;  %v131_v20 = vpop.f32.mrb[0].mxu0 }
  0xf6   :  { %v140_v22 = vadd.f32 %v172_v17, %v139_v18  ;;  %v214_v23 = vpop.f32.mrb[1].mxu1  ;;  %v132_v24 = vadd.f32 %v172_v17, %v131_v20  ;;  %v210_v25 = vpop.f32.mrb[1].mxu0 }
  0xf7   :  { %v142_v26 = vpop.f32.mrb[2].mxu1  ;;  %v134_v28 = vpop.f32.mrb[2].mxu0 }
  0xf8   :  { %v160_v30 = vadd.f32 %v155_v19, %v140_v22  ;;  %v143_v31 = vadd.f32 %v172_v17, %v142_v26  ;;  %v158_v32 = vadd.f32 %v153_v21, %v132_v24  ;;  %v215_v33 = vpop.f32.mrb[3].mxu1  ;;  %v135_v34 = vadd.f32 %v172_v17, %v134_v28  ;;  %v211_v35 = vpop.f32.mrb[3].mxu0 }
  0xfa   :  { %165 = vst [vmem:[%s352_s4 + $0x10] sm:$0xff] %v160_v30  ;;  %v161_v36 = vadd.f32 %v156_v27, %v143_v31  ;;  %163 = vst [vmem:[%s352_s4] sm:$0xff] %v158_v32  ;;  %v159_v37 = vadd.f32 %v154_v29, %v135_v34 }
  0xfc   :  { %166 = vst [vmem:[%s352_s4 + $0x18] sm:$0xff] %v161_v36  ;;  %164 = vst [vmem:[%s352_s4 + $0x8] sm:$0xff] %v159_v37 }
  0xfd   :  { %v147_v38 = vpop.f32.mrb[4].mxu1 }
  0xfe   :  { %v148_v40 = vadd.f32 %v172_v17, %v147_v38  ;;  %v218_v41 = vpop.f32.mrb[5].mxu1 }
  0xff   :  { %v150_v42 = vpop.f32.mrb[6].mxu1 }
 0x100   :  { %v162_v43 = vadd.f32 %v157_v39, %v148_v40  ;;  %v219_v44 = vpop.f32.mrb[7].mxu1 }
 0x102   :  { %167 = vst [vmem:[%s352_s4 + $0x20] sm:$0xff] %v162_v43 }

// kernel: vit_forward.23
= control target key start
LH: loop header
LB: loop body
LE: loop exit
PB: predicated region body
PF: predicated region fallthrough
CT: control target
= control target key end

     0   :  { %vm22_vm0 = vcmask 261120   ;;  %v148_v8 = vmov 0.0   ;;  %vm149_vm1 = vmmov 0   ;;  %s204_s0 = inlined_call_operand.vmem [shape: f32[8,32], index: 0, kind: input, shape index: {}]   ;;  %s205_s3 = inlined_call_operand.vmem [shape: bf16[32,128], index: 3, kind: input, shape index: {}]   ;;  %s206_s1 = inlined_call_operand.vmem [shape: f32[1,32], index: 1, kind: input, shape index: {}]   ;;  %s207_s2 = inlined_call_operand.vmem [shape: f32[1,32], index: 2, kind: input, shape index: {}]   ;;  %s208_s4 = inlined_call_operand.vmem [shape: f32[1,128], index: 4, kind: input, shape index: {}]   ;;  %s209_s5 = inlined_call_operand.vmem [shape: f32[8,128], index: 5, kind: output, shape index: {}]  }
   0x1   :  { %v21_v0 = vld [vmem:[%s204_s0] sm:$0xff]  ;;  %134 = vmatprep.subr.bf16.mxu0 %v148_v8  ;;  %v145_v9 = vld [vmem:[%s205_s3 + $0x8] sm:$0xff]   ;;  %138 = vmatprep.mubr.msk.bf16.mxu0 %vm149_vm1, %v148_v8 }
   0x2   :  { %v23_v1 = vsel %vm22_vm0, %v21_v0, 0.0  ;;  %v144_v7 = vld [vmem:[%s205_s3] sm:$0xff]  }
   0x3   :  { %24 = vadd.xlane.f32.xlu0 %v23_v1  ;;  %135 = vmatpush3.bf16.msra.mxu0 %v144_v7  ;;  %v125_v14 = vld [vmem:[%s206_s1] ss:$0 sm:$0xff] }
   0x4   :  { %136 = vmatprep.subr.bf16.mxu0 %v148_v8  ;;  %v126_v16 = vld [vmem:[%s207_s2] ss:$0 sm:$0xff] }
   0x5   :  { %v127_v20 = vld [vmem:[%s208_s4] ss:$0 sm:$0xff] }
   0x7   :  { %137 = vmatpush3.bf16.msra.mxu0 %v145_v9 }
  0x90   :  { %v25_v2 = vpop.xlane.xlu0 %24 }
  0x91   :  { %v27_v3 = vmul.f32 0.03125, %v25_v2 }
  0x93   :  { %v28_v4 = vsub.f32 %v21_v0, %v27_v3 }
  0x95   :  { %v29_v5 = vmul.f32 %v28_v4, %v28_v4 }
  0x97   :  { %v30_v6 = vsel %vm22_vm0, %v29_v5, 0.0 }
  0x98   :  { %31 = vadd.xlane.f32.xlu0 %v30_v6 }
 0x125   :  { %v32_v10 = vpop.xlane.xlu0 %31 }
 0x126   :  { %v33_v11 = vmul.f32 0.03125, %v32_v10 }
 0x128   :  { %v34_v12 = vadd.f32 1e-06, %v33_v11 }
 0x12a   :  { %146 = vrsqrt.f32 %v34_v12 }
 0x134   :  { %v147_v13 = vpop.eup %146 }
 0x135   :  { %v36_v15 = vmul.f32 %v147_v13, %v28_v4 }
 0x137   :  { %v44_v17 = vmul.f32 %v125_v14, %v36_v15 }
 0x139   :  { %v52_v18 = vadd.f32 %v126_v16, %v44_v17 }
 0x13b   :  { %v53_v19 = vpack.c.bf16 %v52_v18, %v52_v18 }
 0x13d   :  { %139 = vmatmul.mubr.msk.bf16.vlgmr.msra.gmra.mrb[0].mxu0 %vm22_vm0, %v53_v19 }
 0x210   :  { %v114_v21 = vpop.f32.mrb[0].mxu0 }
 0x211   :  { %v115_v22 = vadd.f32 %v127_v20, %v114_v21  ;;  %v140_v23 = vpop.f32.mrb[1].mxu0 }
 0x212   :  { %v117_v24 = vpop.f32.mrb[2].mxu0 }
 0x213   :  { %120 = vst [vmem:[%s209_s5] sm:$0xff] %v115_v22  ;;  %v141_v25 = vpop.f32.mrb[3].mxu0 }

</bundles_post_ra>
